<compile_context>
chip_gen: v5e
topology: v5e:2x2
jax: 0.10.0
libtpu: 0.0.40
codegen_flags: <defaults>
</compile_context>

<pallas_src>
import functools

import jax
import jax.numpy as jnp
from jax.experimental import pallas as pl
from jax.experimental.pallas import tpu as pltpu


def _round_up(n, m):
    return ((n + m - 1) // m) * m


def _gru_head_kernel(x_ref,
                     wih_r_ref, wih_z_ref, wih_n_ref,
                     whh_r_ref, whh_z_ref, whh_n_ref,
                     b_r_ref, b_z_ref, b_in_ref, b_hn_ref,
                     bn_s_ref, bn_b_ref,
                     w1_ref, b1_ref, w2_ref, b2_ref,
                     out_ref, *, seq_len, batch_pad, out_batch):
    """Entire baseGRU forward in one invocation (no time grid)."""
    x = x_ref[...]                                        # (S*BP, F) time-major

    # --- Hoisted, time-parallel input projections: one MXU matmul per gate.
    # r/z gates: b_ih + b_hh folded into one bias.  n gate: b_in added here,
    # b_hn must stay on the hidden projection (inside r * (.)), per PyTorch.
    gi_r = jnp.dot(x, wih_r_ref[...], preferred_element_type=jnp.float32) + b_r_ref[...]
    gi_z = jnp.dot(x, wih_z_ref[...], preferred_element_type=jnp.float32) + b_z_ref[...]
    gi_n = jnp.dot(x, wih_n_ref[...], preferred_element_type=jnp.float32) + b_in_ref[...]

    whh_r = whh_r_ref[...]
    whh_z = whh_z_ref[...]
    whh_n = whh_n_ref[...]
    b_hn = b_hn_ref[...]

    hidden = whh_r.shape[0]
    h = jnp.zeros((batch_pad, hidden), jnp.float32)       # init_hidden: zeros

    # --- Recurrence: fully unrolled, straight-line, static slices.
    # Slice starts are multiples of batch_pad (>= 8 sublanes) -> tile aligned.
    for t in range(seq_len):
        lo = t * batch_pad
        h_r = jnp.dot(h, whh_r, preferred_element_type=jnp.float32)
        h_z = jnp.dot(h, whh_z, preferred_element_type=jnp.float32)
        h_n = jnp.dot(h, whh_n, preferred_element_type=jnp.float32) + b_hn
        r = jax.nn.sigmoid(gi_r[lo:lo + batch_pad, :] + h_r)
        z = jax.nn.sigmoid(gi_z[lo:lo + batch_pad, :] + h_z)
        n = jnp.tanh(gi_n[lo:lo + batch_pad, :] + r * h_n)
        h = (1.0 - z) * n + z * h

    # --- Head: BatchNorm1d (folded) -> Linear -> ELU -> Dropout(id) -> Linear -> Sigmoid
    y = h * bn_s_ref[...] + bn_b_ref[...]
    y = jnp.dot(y, w1_ref[...], preferred_element_type=jnp.float32) + b1_ref[...]
    # ELU(alpha=1); clamp exp argument so the discarded branch never hits inf.
    y = jnp.where(y > 0.0, y, jnp.exp(jnp.minimum(y, 0.0)) - 1.0)
    y = jnp.dot(y, w2_ref[...], preferred_element_type=jnp.float32) + b2_ref[...]
    out_ref[...] = jax.nn.sigmoid(y[:out_batch, :]).astype(out_ref.dtype)


def base_gru_forward(x, params):
    """x: (B, S, F) float32 (batch_first, as in PyTorch); returns (B, O) float32."""
    B, S, F = x.shape
    O = params["w2_t"].shape[1]

    # Pad batch to a sublane multiple so per-timestep slabs are tile-aligned.
    BP = _round_up(max(B, 8), 8)
    x_tbf = jnp.transpose(x, (1, 0, 2))                      # (S, B, F) time-major
    x_tbf = jnp.pad(x_tbf, ((0, 0), (0, BP - B), (0, 0)))    # (S, BP, F)
    x_flat = x_tbf.reshape(S * BP, F)                        # (S*BP, F)

    kernel = functools.partial(_gru_head_kernel,
                               seq_len=S, batch_pad=BP, out_batch=B)
    vmem = pl.BlockSpec(memory_space=pltpu.MemorySpace.VMEM)  # whole array in VMEM

    return pl.pallas_call(
        kernel,
        out_shape=jax.ShapeDtypeStruct((B, O), jnp.float32),
        in_specs=[vmem] * 17,
        out_specs=vmem,
    )(x_flat,
      params["wih_r"], params["wih_z"], params["wih_n"],
      params["whh_r"], params["whh_z"], params["whh_n"],
      params["b_r"], params["b_z"], params["b_in"], params["b_hn"],
      params["bn_s"], params["bn_b"],
      params["w1_t"], params["b1"], params["w2_t"], params["b2"])


def init_params(key, n_feature, hidden_size, output_size):
    """Deterministic synthetic parameters mirroring the PyTorch module shapes."""
    ks = jax.random.split(key, 8)
    H, F, O = hidden_size, n_feature, output_size
    k_in = 1.0 / jnp.sqrt(H)

    # nn.GRU default init: U(-1/sqrt(H), 1/sqrt(H)); weight_hh overridden by
    # xavier_normal_ and bias_hh filled with 0 (init_weight()).
    w_ih = jax.random.uniform(ks[0], (3 * H, F), jnp.float32, -k_in, k_in)
    xav_std = jnp.sqrt(2.0 / (3 * H + H))
    w_hh = jax.random.normal(ks[1], (3 * H, H), jnp.float32) * xav_std
    b_ih = jax.random.uniform(ks[2], (3 * H,), jnp.float32, -k_in, k_in)
    b_hh = jnp.zeros((3 * H,), jnp.float32)

    # Split into per-gate matrices (PyTorch gate order: r, z, n), pre-transposed
    # so every in-kernel matmul is plain (rows, K) @ (K, H).
    def gate(w, g):
        return w[g * H:(g + 1) * H, :].T

    wih_r, wih_z, wih_n = gate(w_ih, 0), gate(w_ih, 1), gate(w_ih, 2)
    whh_r, whh_z, whh_n = gate(w_hh, 0), gate(w_hh, 1), gate(w_hh, 2)

    b_r = (b_ih[0:H] + b_hh[0:H]).reshape(1, H)
    b_z = (b_ih[H:2 * H] + b_hh[H:2 * H]).reshape(1, H)
    b_in = b_ih[2 * H:3 * H].reshape(1, H)
    b_hn = b_hh[2 * H:3 * H].reshape(1, H)

    # BatchNorm1d(H) at init, inference: gamma=1, beta=0, mean=0, var=1, eps=1e-5.
    eps = 1e-5
    gamma = jnp.ones((H,), jnp.float32)
    beta = jnp.zeros((H,), jnp.float32)
    bn_s = (gamma / jnp.sqrt(1.0 + eps)).reshape(1, H)
    bn_b = beta.reshape(1, H)

    # Linear(H, 15) and Linear(15, O): U(-1/sqrt(fan_in), 1/sqrt(fan_in))
    k1 = 1.0 / jnp.sqrt(H)
    w1 = jax.random.uniform(ks[3], (15, H), jnp.float32, -k1, k1)
    b1 = jax.random.uniform(ks[4], (15,), jnp.float32, -k1, k1)
    k2 = 1.0 / jnp.sqrt(15.0)
    w2 = jax.random.uniform(ks[5], (O, 15), jnp.float32, -k2, k2)
    b2 = jax.random.uniform(ks[6], (O,), jnp.float32, -k2, k2)

    return dict(
        wih_r=wih_r, wih_z=wih_z, wih_n=wih_n,
        whh_r=whh_r, whh_z=whh_z, whh_n=whh_n,
        b_r=b_r, b_z=b_z, b_in=b_in, b_hn=b_hn,
        bn_s=bn_s, bn_b=bn_b,
        w1_t=w1.T, b1=b1.reshape(1, 15),
        w2_t=w2.T, b2=b2.reshape(1, O),
    )


def base_gru_reference(x, params):
    """Pure-JAX reference with identical math (for correctness checking)."""
    B, S, F = x.shape
    H = params["whh_r"].shape[0]
    h = jnp.zeros((B, H), jnp.float32)
    for t in range(S):
        x_t = x[:, t, :]
        r = jax.nn.sigmoid(x_t @ params["wih_r"] + params["b_r"] + h @ params["whh_r"])
        z = jax.nn.sigmoid(x_t @ params["wih_z"] + params["b_z"] + h @ params["whh_z"])
        n = jnp.tanh(x_t @ params["wih_n"] + params["b_in"]
                     + r * (h @ params["whh_n"] + params["b_hn"]))
        h = (1.0 - z) * n + z * h
    y = h * params["bn_s"] + params["bn_b"]
    y = y @ params["w1_t"] + params["b1"]
    y = jnp.where(y > 0.0, y, jnp.exp(jnp.minimum(y, 0.0)) - 1.0)
    y = y @ params["w2_t"] + params["b2"]
    return jax.nn.sigmoid(y)


if __name__ == "__main__":
    # Small, forward-consistent shapes: batch=2, seq=8, n_feature=4,
    # hidden_size=32, output_size=2.
    B, S, F, H, O = 2, 8, 4, 32, 2

    key = jax.random.PRNGKey(0)
    k_x, k_p = jax.random.split(key)
    x = jax.random.normal(k_x, (B, S, F), jnp.float32)
    params = init_params(k_p, n_feature=F, hidden_size=H, output_size=O)

    out = jax.block_until_ready(base_gru_forward(x, params))
    ref = jax.block_until_ready(base_gru_reference(x, params))

    assert out.shape == (B, O) and out.dtype == jnp.float32
    assert bool(jnp.all((out >= 0.0) & (out <= 1.0)))          # sigmoid range
    # Loose tolerance to accommodate MXU precision-mode differences between
    # the Pallas matmuls and the XLA reference.
    assert bool(jnp.allclose(out, ref, atol=2e-3, rtol=2e-3))
    print("KERNEL_OK")
</pallas_src>

<mosaic_0001>
module attributes {stable_mosaic.version = 11 : i64} {
  func.func @_gru_head_kernel(%arg0: memref<64x4xf32, #tpu.memory_space<vmem>>, %arg1: memref<4x32xf32, #tpu.memory_space<vmem>>, %arg2: memref<4x32xf32, #tpu.memory_space<vmem>>, %arg3: memref<4x32xf32, #tpu.memory_space<vmem>>, %arg4: memref<32x32xf32, #tpu.memory_space<vmem>>, %arg5: memref<32x32xf32, #tpu.memory_space<vmem>>, %arg6: memref<32x32xf32, #tpu.memory_space<vmem>>, %arg7: memref<1x32xf32, #tpu.memory_space<vmem>>, %arg8: memref<1x32xf32, #tpu.memory_space<vmem>>, %arg9: memref<1x32xf32, #tpu.memory_space<vmem>>, %arg10: memref<1x32xf32, #tpu.memory_space<vmem>>, %arg11: memref<1x32xf32, #tpu.memory_space<vmem>>, %arg12: memref<1x32xf32, #tpu.memory_space<vmem>>, %arg13: memref<32x15xf32, #tpu.memory_space<vmem>>, %arg14: memref<1x15xf32, #tpu.memory_space<vmem>>, %arg15: memref<15x2xf32, #tpu.memory_space<vmem>>, %arg16: memref<1x2xf32, #tpu.memory_space<vmem>>, %arg17: memref<2x2xf32, #tpu.memory_space<vmem>>) attributes {dimension_semantics = [], scalar_prefetch = 0 : i64, scratch_operands = 0 : i64, tpu.core_type = #tpu.core_type<tc>} {
    %c0 = arith.constant 0 : index
    %c0_0 = arith.constant 0 : index
    %0 = vector.load %arg0[%c0, %c0_0] : memref<64x4xf32, #tpu.memory_space<vmem>>, vector<64x4xf32>
    %c0_1 = arith.constant 0 : index
    %c0_2 = arith.constant 0 : index
    %1 = vector.load %arg1[%c0_1, %c0_2] : memref<4x32xf32, #tpu.memory_space<vmem>>, vector<4x32xf32>
    %cst = arith.constant dense<0.000000e+00> : vector<64x32xf32>
    %2 = tpu.matmul %0, %1, %cst {dimension_numbers = #tpu.dot_dimension_numbers<[1], [0], [0], [1], [0, 0, 1, 1], [], []>} : vector<64x4xf32>, vector<4x32xf32>, vector<64x32xf32> -> vector<64x32xf32>
    %c0_3 = arith.constant 0 : index
    %c0_4 = arith.constant 0 : index
    %3 = vector.load %arg7[%c0_3, %c0_4] : memref<1x32xf32, #tpu.memory_space<vmem>>, vector<1x32xf32>
    %4 = vector.broadcast %3 : vector<1x32xf32> to vector<64x32xf32>
    %5 = arith.addf %2, %4 : vector<64x32xf32>
    %c0_5 = arith.constant 0 : index
    %c0_6 = arith.constant 0 : index
    %6 = vector.load %arg2[%c0_5, %c0_6] : memref<4x32xf32, #tpu.memory_space<vmem>>, vector<4x32xf32>
    %cst_7 = arith.constant dense<0.000000e+00> : vector<64x32xf32>
    %7 = tpu.matmul %0, %6, %cst_7 {dimension_numbers = #tpu.dot_dimension_numbers<[1], [0], [0], [1], [0, 0, 1, 1], [], []>} : vector<64x4xf32>, vector<4x32xf32>, vector<64x32xf32> -> vector<64x32xf32>
    %c0_8 = arith.constant 0 : index
    %c0_9 = arith.constant 0 : index
    %8 = vector.load %arg8[%c0_8, %c0_9] : memref<1x32xf32, #tpu.memory_space<vmem>>, vector<1x32xf32>
    %9 = vector.broadcast %8 : vector<1x32xf32> to vector<64x32xf32>
    %10 = arith.addf %7, %9 : vector<64x32xf32>
    %c0_10 = arith.constant 0 : index
    %c0_11 = arith.constant 0 : index
    %11 = vector.load %arg3[%c0_10, %c0_11] : memref<4x32xf32, #tpu.memory_space<vmem>>, vector<4x32xf32>
    %cst_12 = arith.constant dense<0.000000e+00> : vector<64x32xf32>
    %12 = tpu.matmul %0, %11, %cst_12 {dimension_numbers = #tpu.dot_dimension_numbers<[1], [0], [0], [1], [0, 0, 1, 1], [], []>} : vector<64x4xf32>, vector<4x32xf32>, vector<64x32xf32> -> vector<64x32xf32>
    %c0_13 = arith.constant 0 : index
    %c0_14 = arith.constant 0 : index
    %13 = vector.load %arg9[%c0_13, %c0_14] : memref<1x32xf32, #tpu.memory_space<vmem>>, vector<1x32xf32>
    %14 = vector.broadcast %13 : vector<1x32xf32> to vector<64x32xf32>
    %15 = arith.addf %12, %14 : vector<64x32xf32>
    %c0_15 = arith.constant 0 : index
    %c0_16 = arith.constant 0 : index
    %16 = vector.load %arg4[%c0_15, %c0_16] : memref<32x32xf32, #tpu.memory_space<vmem>>, vector<32x32xf32>
    %c0_17 = arith.constant 0 : index
    %c0_18 = arith.constant 0 : index
    %17 = vector.load %arg5[%c0_17, %c0_18] : memref<32x32xf32, #tpu.memory_space<vmem>>, vector<32x32xf32>
    %c0_19 = arith.constant 0 : index
    %c0_20 = arith.constant 0 : index
    %18 = vector.load %arg6[%c0_19, %c0_20] : memref<32x32xf32, #tpu.memory_space<vmem>>, vector<32x32xf32>
    %c0_21 = arith.constant 0 : index
    %c0_22 = arith.constant 0 : index
    %19 = vector.load %arg10[%c0_21, %c0_22] : memref<1x32xf32, #tpu.memory_space<vmem>>, vector<1x32xf32>
    %cst_23 = arith.constant 0.000000e+00 : f32
    %20 = vector.broadcast %cst_23 : f32 to vector<8x32xf32>
    %cst_24 = arith.constant dense<0.000000e+00> : vector<8x32xf32>
    %21 = tpu.matmul %20, %16, %cst_24 {dimension_numbers = #tpu.dot_dimension_numbers<[1], [0], [0], [1], [0, 0, 1, 1], [], []>} : vector<8x32xf32>, vector<32x32xf32>, vector<8x32xf32> -> vector<8x32xf32>
    %cst_25 = arith.constant dense<0.000000e+00> : vector<8x32xf32>
    %22 = tpu.matmul %20, %17, %cst_25 {dimension_numbers = #tpu.dot_dimension_numbers<[1], [0], [0], [1], [0, 0, 1, 1], [], []>} : vector<8x32xf32>, vector<32x32xf32>, vector<8x32xf32> -> vector<8x32xf32>
    %cst_26 = arith.constant dense<0.000000e+00> : vector<8x32xf32>
    %23 = tpu.matmul %20, %18, %cst_26 {dimension_numbers = #tpu.dot_dimension_numbers<[1], [0], [0], [1], [0, 0, 1, 1], [], []>} : vector<8x32xf32>, vector<32x32xf32>, vector<8x32xf32> -> vector<8x32xf32>
    %24 = vector.broadcast %19 : vector<1x32xf32> to vector<8x32xf32>
    %25 = arith.addf %23, %24 : vector<8x32xf32>
    %26 = vector.extract_strided_slice %5 {offsets = [0, 0], sizes = [8, 32], strides = [1, 1]} : vector<64x32xf32> to vector<8x32xf32>
    %27 = arith.addf %26, %21 : vector<8x32xf32>
    %28 = arith.negf %27 : vector<8x32xf32>
    %29 = math.exp %28 : vector<8x32xf32>
    %cst_27 = arith.constant 1.000000e+00 : f32
    %30 = vector.broadcast %cst_27 : f32 to vector<8x32xf32>
    %31 = arith.addf %30, %29 : vector<8x32xf32>
    %32 = arith.divf %30, %31 : vector<8x32xf32>
    %33 = vector.extract_strided_slice %10 {offsets = [0, 0], sizes = [8, 32], strides = [1, 1]} : vector<64x32xf32> to vector<8x32xf32>
    %34 = arith.addf %33, %22 : vector<8x32xf32>
    %35 = arith.negf %34 : vector<8x32xf32>
    %36 = math.exp %35 : vector<8x32xf32>
    %cst_28 = arith.constant 1.000000e+00 : f32
    %37 = vector.broadcast %cst_28 : f32 to vector<8x32xf32>
    %38 = arith.addf %37, %36 : vector<8x32xf32>
    %39 = arith.divf %37, %38 : vector<8x32xf32>
    %40 = vector.extract_strided_slice %15 {offsets = [0, 0], sizes = [8, 32], strides = [1, 1]} : vector<64x32xf32> to vector<8x32xf32>
    %41 = arith.mulf %32, %25 : vector<8x32xf32>
    %42 = arith.addf %40, %41 : vector<8x32xf32>
    %43 = math.tanh %42 : vector<8x32xf32>
    %cst_29 = arith.constant 1.000000e+00 : f32
    %44 = vector.broadcast %cst_29 : f32 to vector<8x32xf32>
    %45 = arith.subf %44, %39 : vector<8x32xf32>
    %46 = arith.mulf %45, %43 : vector<8x32xf32>
    %47 = arith.mulf %39, %20 : vector<8x32xf32>
    %48 = arith.addf %46, %47 : vector<8x32xf32>
    %cst_30 = arith.constant dense<0.000000e+00> : vector<8x32xf32>
    %49 = tpu.matmul %48, %16, %cst_30 {dimension_numbers = #tpu.dot_dimension_numbers<[1], [0], [0], [1], [0, 0, 1, 1], [], []>} : vector<8x32xf32>, vector<32x32xf32>, vector<8x32xf32> -> vector<8x32xf32>
    %cst_31 = arith.constant dense<0.000000e+00> : vector<8x32xf32>
    %50 = tpu.matmul %48, %17, %cst_31 {dimension_numbers = #tpu.dot_dimension_numbers<[1], [0], [0], [1], [0, 0, 1, 1], [], []>} : vector<8x32xf32>, vector<32x32xf32>, vector<8x32xf32> -> vector<8x32xf32>
    %cst_32 = arith.constant dense<0.000000e+00> : vector<8x32xf32>
    %51 = tpu.matmul %48, %18, %cst_32 {dimension_numbers = #tpu.dot_dimension_numbers<[1], [0], [0], [1], [0, 0, 1, 1], [], []>} : vector<8x32xf32>, vector<32x32xf32>, vector<8x32xf32> -> vector<8x32xf32>
    %52 = vector.broadcast %19 : vector<1x32xf32> to vector<8x32xf32>
    %53 = arith.addf %51, %52 : vector<8x32xf32>
    %54 = vector.extract_strided_slice %5 {offsets = [8, 0], sizes = [8, 32], strides = [1, 1]} : vector<64x32xf32> to vector<8x32xf32>
    %55 = arith.addf %54, %49 : vector<8x32xf32>
    %56 = arith.negf %55 : vector<8x32xf32>
    %57 = math.exp %56 : vector<8x32xf32>
    %cst_33 = arith.constant 1.000000e+00 : f32
    %58 = vector.broadcast %cst_33 : f32 to vector<8x32xf32>
    %59 = arith.addf %58, %57 : vector<8x32xf32>
    %60 = arith.divf %58, %59 : vector<8x32xf32>
    %61 = vector.extract_strided_slice %10 {offsets = [8, 0], sizes = [8, 32], strides = [1, 1]} : vector<64x32xf32> to vector<8x32xf32>
    %62 = arith.addf %61, %50 : vector<8x32xf32>
    %63 = arith.negf %62 : vector<8x32xf32>
    %64 = math.exp %63 : vector<8x32xf32>
    %cst_34 = arith.constant 1.000000e+00 : f32
    %65 = vector.broadcast %cst_34 : f32 to vector<8x32xf32>
    %66 = arith.addf %65, %64 : vector<8x32xf32>
    %67 = arith.divf %65, %66 : vector<8x32xf32>
    %68 = vector.extract_strided_slice %15 {offsets = [8, 0], sizes = [8, 32], strides = [1, 1]} : vector<64x32xf32> to vector<8x32xf32>
    %69 = arith.mulf %60, %53 : vector<8x32xf32>
    %70 = arith.addf %68, %69 : vector<8x32xf32>
    %71 = math.tanh %70 : vector<8x32xf32>
    %cst_35 = arith.constant 1.000000e+00 : f32
    %72 = vector.broadcast %cst_35 : f32 to vector<8x32xf32>
    %73 = arith.subf %72, %67 : vector<8x32xf32>
    %74 = arith.mulf %73, %71 : vector<8x32xf32>
    %75 = arith.mulf %67, %48 : vector<8x32xf32>
    %76 = arith.addf %74, %75 : vector<8x32xf32>
    %cst_36 = arith.constant dense<0.000000e+00> : vector<8x32xf32>
    %77 = tpu.matmul %76, %16, %cst_36 {dimension_numbers = #tpu.dot_dimension_numbers<[1], [0], [0], [1], [0, 0, 1, 1], [], []>} : vector<8x32xf32>, vector<32x32xf32>, vector<8x32xf32> -> vector<8x32xf32>
    %cst_37 = arith.constant dense<0.000000e+00> : vector<8x32xf32>
    %78 = tpu.matmul %76, %17, %cst_37 {dimension_numbers = #tpu.dot_dimension_numbers<[1], [0], [0], [1], [0, 0, 1, 1], [], []>} : vector<8x32xf32>, vector<32x32xf32>, vector<8x32xf32> -> vector<8x32xf32>
    %cst_38 = arith.constant dense<0.000000e+00> : vector<8x32xf32>
    %79 = tpu.matmul %76, %18, %cst_38 {dimension_numbers = #tpu.dot_dimension_numbers<[1], [0], [0], [1], [0, 0, 1, 1], [], []>} : vector<8x32xf32>, vector<32x32xf32>, vector<8x32xf32> -> vector<8x32xf32>
    %80 = vector.broadcast %19 : vector<1x32xf32> to vector<8x32xf32>
    %81 = arith.addf %79, %80 : vector<8x32xf32>
    %82 = vector.extract_strided_slice %5 {offsets = [16, 0], sizes = [8, 32], strides = [1, 1]} : vector<64x32xf32> to vector<8x32xf32>
    %83 = arith.addf %82, %77 : vector<8x32xf32>
    %84 = arith.negf %83 : vector<8x32xf32>
    %85 = math.exp %84 : vector<8x32xf32>
    %cst_39 = arith.constant 1.000000e+00 : f32
    %86 = vector.broadcast %cst_39 : f32 to vector<8x32xf32>
    %87 = arith.addf %86, %85 : vector<8x32xf32>
    %88 = arith.divf %86, %87 : vector<8x32xf32>
    %89 = vector.extract_strided_slice %10 {offsets = [16, 0], sizes = [8, 32], strides = [1, 1]} : vector<64x32xf32> to vector<8x32xf32>
    %90 = arith.addf %89, %78 : vector<8x32xf32>
    %91 = arith.negf %90 : vector<8x32xf32>
    %92 = math.exp %91 : vector<8x32xf32>
    %cst_40 = arith.constant 1.000000e+00 : f32
    %93 = vector.broadcast %cst_40 : f32 to vector<8x32xf32>
    %94 = arith.addf %93, %92 : vector<8x32xf32>
    %95 = arith.divf %93, %94 : vector<8x32xf32>
    %96 = vector.extract_strided_slice %15 {offsets = [16, 0], sizes = [8, 32], strides = [1, 1]} : vector<64x32xf32> to vector<8x32xf32>
    %97 = arith.mulf %88, %81 : vector<8x32xf32>
    %98 = arith.addf %96, %97 : vector<8x32xf32>
    %99 = math.tanh %98 : vector<8x32xf32>
    %cst_41 = arith.constant 1.000000e+00 : f32
    %100 = vector.broadcast %cst_41 : f32 to vector<8x32xf32>
    %101 = arith.subf %100, %95 : vector<8x32xf32>
    %102 = arith.mulf %101, %99 : vector<8x32xf32>
    %103 = arith.mulf %95, %76 : vector<8x32xf32>
    %104 = arith.addf %102, %103 : vector<8x32xf32>
    %cst_42 = arith.constant dense<0.000000e+00> : vector<8x32xf32>
    %105 = tpu.matmul %104, %16, %cst_42 {dimension_numbers = #tpu.dot_dimension_numbers<[1], [0], [0], [1], [0, 0, 1, 1], [], []>} : vector<8x32xf32>, vector<32x32xf32>, vector<8x32xf32> -> vector<8x32xf32>
    %cst_43 = arith.constant dense<0.000000e+00> : vector<8x32xf32>
    %106 = tpu.matmul %104, %17, %cst_43 {dimension_numbers = #tpu.dot_dimension_numbers<[1], [0], [0], [1], [0, 0, 1, 1], [], []>} : vector<8x32xf32>, vector<32x32xf32>, vector<8x32xf32> -> vector<8x32xf32>
    %cst_44 = arith.constant dense<0.000000e+00> : vector<8x32xf32>
    %107 = tpu.matmul %104, %18, %cst_44 {dimension_numbers = #tpu.dot_dimension_numbers<[1], [0], [0], [1], [0, 0, 1, 1], [], []>} : vector<8x32xf32>, vector<32x32xf32>, vector<8x32xf32> -> vector<8x32xf32>
    %108 = vector.broadcast %19 : vector<1x32xf32> to vector<8x32xf32>
    %109 = arith.addf %107, %108 : vector<8x32xf32>
    %110 = vector.extract_strided_slice %5 {offsets = [24, 0], sizes = [8, 32], strides = [1, 1]} : vector<64x32xf32> to vector<8x32xf32>
    %111 = arith.addf %110, %105 : vector<8x32xf32>
    %112 = arith.negf %111 : vector<8x32xf32>
    %113 = math.exp %112 : vector<8x32xf32>
    %cst_45 = arith.constant 1.000000e+00 : f32
    %114 = vector.broadcast %cst_45 : f32 to vector<8x32xf32>
    %115 = arith.addf %114, %113 : vector<8x32xf32>
    %116 = arith.divf %114, %115 : vector<8x32xf32>
    %117 = vector.extract_strided_slice %10 {offsets = [24, 0], sizes = [8, 32], strides = [1, 1]} : vector<64x32xf32> to vector<8x32xf32>
    %118 = arith.addf %117, %106 : vector<8x32xf32>
    %119 = arith.negf %118 : vector<8x32xf32>
    %120 = math.exp %119 : vector<8x32xf32>
    %cst_46 = arith.constant 1.000000e+00 : f32
    %121 = vector.broadcast %cst_46 : f32 to vector<8x32xf32>
    %122 = arith.addf %121, %120 : vector<8x32xf32>
    %123 = arith.divf %121, %122 : vector<8x32xf32>
    %124 = vector.extract_strided_slice %15 {offsets = [24, 0], sizes = [8, 32], strides = [1, 1]} : vector<64x32xf32> to vector<8x32xf32>
    %125 = arith.mulf %116, %109 : vector<8x32xf32>
    %126 = arith.addf %124, %125 : vector<8x32xf32>
    %127 = math.tanh %126 : vector<8x32xf32>
    %cst_47 = arith.constant 1.000000e+00 : f32
    %128 = vector.broadcast %cst_47 : f32 to vector<8x32xf32>
    %129 = arith.subf %128, %123 : vector<8x32xf32>
    %130 = arith.mulf %129, %127 : vector<8x32xf32>
    %131 = arith.mulf %123, %104 : vector<8x32xf32>
    %132 = arith.addf %130, %131 : vector<8x32xf32>
    %cst_48 = arith.constant dense<0.000000e+00> : vector<8x32xf32>
    %133 = tpu.matmul %132, %16, %cst_48 {dimension_numbers = #tpu.dot_dimension_numbers<[1], [0], [0], [1], [0, 0, 1, 1], [], []>} : vector<8x32xf32>, vector<32x32xf32>, vector<8x32xf32> -> vector<8x32xf32>
    %cst_49 = arith.constant dense<0.000000e+00> : vector<8x32xf32>
    %134 = tpu.matmul %132, %17, %cst_49 {dimension_numbers = #tpu.dot_dimension_numbers<[1], [0], [0], [1], [0, 0, 1, 1], [], []>} : vector<8x32xf32>, vector<32x32xf32>, vector<8x32xf32> -> vector<8x32xf32>
    %cst_50 = arith.constant dense<0.000000e+00> : vector<8x32xf32>
    %135 = tpu.matmul %132, %18, %cst_50 {dimension_numbers = #tpu.dot_dimension_numbers<[1], [0], [0], [1], [0, 0, 1, 1], [], []>} : vector<8x32xf32>, vector<32x32xf32>, vector<8x32xf32> -> vector<8x32xf32>
    %136 = vector.broadcast %19 : vector<1x32xf32> to vector<8x32xf32>
    %137 = arith.addf %135, %136 : vector<8x32xf32>
    %138 = vector.extract_strided_slice %5 {offsets = [32, 0], sizes = [8, 32], strides = [1, 1]} : vector<64x32xf32> to vector<8x32xf32>
    %139 = arith.addf %138, %133 : vector<8x32xf32>
    %140 = arith.negf %139 : vector<8x32xf32>
    %141 = math.exp %140 : vector<8x32xf32>
    %cst_51 = arith.constant 1.000000e+00 : f32
    %142 = vector.broadcast %cst_51 : f32 to vector<8x32xf32>
    %143 = arith.addf %142, %141 : vector<8x32xf32>
    %144 = arith.divf %142, %143 : vector<8x32xf32>
    %145 = vector.extract_strided_slice %10 {offsets = [32, 0], sizes = [8, 32], strides = [1, 1]} : vector<64x32xf32> to vector<8x32xf32>
    %146 = arith.addf %145, %134 : vector<8x32xf32>
    %147 = arith.negf %146 : vector<8x32xf32>
    %148 = math.exp %147 : vector<8x32xf32>
    %cst_52 = arith.constant 1.000000e+00 : f32
    %149 = vector.broadcast %cst_52 : f32 to vector<8x32xf32>
    %150 = arith.addf %149, %148 : vector<8x32xf32>
    %151 = arith.divf %149, %150 : vector<8x32xf32>
    %152 = vector.extract_strided_slice %15 {offsets = [32, 0], sizes = [8, 32], strides = [1, 1]} : vector<64x32xf32> to vector<8x32xf32>
    %153 = arith.mulf %144, %137 : vector<8x32xf32>
    %154 = arith.addf %152, %153 : vector<8x32xf32>
    %155 = math.tanh %154 : vector<8x32xf32>
    %cst_53 = arith.constant 1.000000e+00 : f32
    %156 = vector.broadcast %cst_53 : f32 to vector<8x32xf32>
    %157 = arith.subf %156, %151 : vector<8x32xf32>
    %158 = arith.mulf %157, %155 : vector<8x32xf32>
    %159 = arith.mulf %151, %132 : vector<8x32xf32>
    %160 = arith.addf %158, %159 : vector<8x32xf32>
    %cst_54 = arith.constant dense<0.000000e+00> : vector<8x32xf32>
    %161 = tpu.matmul %160, %16, %cst_54 {dimension_numbers = #tpu.dot_dimension_numbers<[1], [0], [0], [1], [0, 0, 1, 1], [], []>} : vector<8x32xf32>, vector<32x32xf32>, vector<8x32xf32> -> vector<8x32xf32>
    %cst_55 = arith.constant dense<0.000000e+00> : vector<8x32xf32>
    %162 = tpu.matmul %160, %17, %cst_55 {dimension_numbers = #tpu.dot_dimension_numbers<[1], [0], [0], [1], [0, 0, 1, 1], [], []>} : vector<8x32xf32>, vector<32x32xf32>, vector<8x32xf32> -> vector<8x32xf32>
    %cst_56 = arith.constant dense<0.000000e+00> : vector<8x32xf32>
    %163 = tpu.matmul %160, %18, %cst_56 {dimension_numbers = #tpu.dot_dimension_numbers<[1], [0], [0], [1], [0, 0, 1, 1], [], []>} : vector<8x32xf32>, vector<32x32xf32>, vector<8x32xf32> -> vector<8x32xf32>
    %164 = vector.broadcast %19 : vector<1x32xf32> to vector<8x32xf32>
    %165 = arith.addf %163, %164 : vector<8x32xf32>
    %166 = vector.extract_strided_slice %5 {offsets = [40, 0], sizes = [8, 32], strides = [1, 1]} : vector<64x32xf32> to vector<8x32xf32>
    %167 = arith.addf %166, %161 : vector<8x32xf32>
    %168 = arith.negf %167 : vector<8x32xf32>
    %169 = math.exp %168 : vector<8x32xf32>
    %cst_57 = arith.constant 1.000000e+00 : f32
    %170 = vector.broadcast %cst_57 : f32 to vector<8x32xf32>
    %171 = arith.addf %170, %169 : vector<8x32xf32>
    %172 = arith.divf %170, %171 : vector<8x32xf32>
    %173 = vector.extract_strided_slice %10 {offsets = [40, 0], sizes = [8, 32], strides = [1, 1]} : vector<64x32xf32> to vector<8x32xf32>
    %174 = arith.addf %173, %162 : vector<8x32xf32>
    %175 = arith.negf %174 : vector<8x32xf32>
    %176 = math.exp %175 : vector<8x32xf32>
    %cst_58 = arith.constant 1.000000e+00 : f32
    %177 = vector.broadcast %cst_58 : f32 to vector<8x32xf32>
    %178 = arith.addf %177, %176 : vector<8x32xf32>
    %179 = arith.divf %177, %178 : vector<8x32xf32>
    %180 = vector.extract_strided_slice %15 {offsets = [40, 0], sizes = [8, 32], strides = [1, 1]} : vector<64x32xf32> to vector<8x32xf32>
    %181 = arith.mulf %172, %165 : vector<8x32xf32>
    %182 = arith.addf %180, %181 : vector<8x32xf32>
    %183 = math.tanh %182 : vector<8x32xf32>
    %cst_59 = arith.constant 1.000000e+00 : f32
    %184 = vector.broadcast %cst_59 : f32 to vector<8x32xf32>
    %185 = arith.subf %184, %179 : vector<8x32xf32>
    %186 = arith.mulf %185, %183 : vector<8x32xf32>
    %187 = arith.mulf %179, %160 : vector<8x32xf32>
    %188 = arith.addf %186, %187 : vector<8x32xf32>
    %cst_60 = arith.constant dense<0.000000e+00> : vector<8x32xf32>
    %189 = tpu.matmul %188, %16, %cst_60 {dimension_numbers = #tpu.dot_dimension_numbers<[1], [0], [0], [1], [0, 0, 1, 1], [], []>} : vector<8x32xf32>, vector<32x32xf32>, vector<8x32xf32> -> vector<8x32xf32>
    %cst_61 = arith.constant dense<0.000000e+00> : vector<8x32xf32>
    %190 = tpu.matmul %188, %17, %cst_61 {dimension_numbers = #tpu.dot_dimension_numbers<[1], [0], [0], [1], [0, 0, 1, 1], [], []>} : vector<8x32xf32>, vector<32x32xf32>, vector<8x32xf32> -> vector<8x32xf32>
    %cst_62 = arith.constant dense<0.000000e+00> : vector<8x32xf32>
    %191 = tpu.matmul %188, %18, %cst_62 {dimension_numbers = #tpu.dot_dimension_numbers<[1], [0], [0], [1], [0, 0, 1, 1], [], []>} : vector<8x32xf32>, vector<32x32xf32>, vector<8x32xf32> -> vector<8x32xf32>
    %192 = vector.broadcast %19 : vector<1x32xf32> to vector<8x32xf32>
    %193 = arith.addf %191, %192 : vector<8x32xf32>
    %194 = vector.extract_strided_slice %5 {offsets = [48, 0], sizes = [8, 32], strides = [1, 1]} : vector<64x32xf32> to vector<8x32xf32>
    %195 = arith.addf %194, %189 : vector<8x32xf32>
    %196 = arith.negf %195 : vector<8x32xf32>
    %197 = math.exp %196 : vector<8x32xf32>
    %cst_63 = arith.constant 1.000000e+00 : f32
    %198 = vector.broadcast %cst_63 : f32 to vector<8x32xf32>
    %199 = arith.addf %198, %197 : vector<8x32xf32>
    %200 = arith.divf %198, %199 : vector<8x32xf32>
    %201 = vector.extract_strided_slice %10 {offsets = [48, 0], sizes = [8, 32], strides = [1, 1]} : vector<64x32xf32> to vector<8x32xf32>
    %202 = arith.addf %201, %190 : vector<8x32xf32>
    %203 = arith.negf %202 : vector<8x32xf32>
    %204 = math.exp %203 : vector<8x32xf32>
    %cst_64 = arith.constant 1.000000e+00 : f32
    %205 = vector.broadcast %cst_64 : f32 to vector<8x32xf32>
    %206 = arith.addf %205, %204 : vector<8x32xf32>
    %207 = arith.divf %205, %206 : vector<8x32xf32>
    %208 = vector.extract_strided_slice %15 {offsets = [48, 0], sizes = [8, 32], strides = [1, 1]} : vector<64x32xf32> to vector<8x32xf32>
    %209 = arith.mulf %200, %193 : vector<8x32xf32>
    %210 = arith.addf %208, %209 : vector<8x32xf32>
    %211 = math.tanh %210 : vector<8x32xf32>
    %cst_65 = arith.constant 1.000000e+00 : f32
    %212 = vector.broadcast %cst_65 : f32 to vector<8x32xf32>
    %213 = arith.subf %212, %207 : vector<8x32xf32>
    %214 = arith.mulf %213, %211 : vector<8x32xf32>
    %215 = arith.mulf %207, %188 : vector<8x32xf32>
    %216 = arith.addf %214, %215 : vector<8x32xf32>
    %cst_66 = arith.constant dense<0.000000e+00> : vector<8x32xf32>
    %217 = tpu.matmul %216, %16, %cst_66 {dimension_numbers = #tpu.dot_dimension_numbers<[1], [0], [0], [1], [0, 0, 1, 1], [], []>} : vector<8x32xf32>, vector<32x32xf32>, vector<8x32xf32> -> vector<8x32xf32>
    %cst_67 = arith.constant dense<0.000000e+00> : vector<8x32xf32>
    %218 = tpu.matmul %216, %17, %cst_67 {dimension_numbers = #tpu.dot_dimension_numbers<[1], [0], [0], [1], [0, 0, 1, 1], [], []>} : vector<8x32xf32>, vector<32x32xf32>, vector<8x32xf32> -> vector<8x32xf32>
    %cst_68 = arith.constant dense<0.000000e+00> : vector<8x32xf32>
    %219 = tpu.matmul %216, %18, %cst_68 {dimension_numbers = #tpu.dot_dimension_numbers<[1], [0], [0], [1], [0, 0, 1, 1], [], []>} : vector<8x32xf32>, vector<32x32xf32>, vector<8x32xf32> -> vector<8x32xf32>
    %220 = vector.broadcast %19 : vector<1x32xf32> to vector<8x32xf32>
    %221 = arith.addf %219, %220 : vector<8x32xf32>
    %222 = vector.extract_strided_slice %5 {offsets = [56, 0], sizes = [8, 32], strides = [1, 1]} : vector<64x32xf32> to vector<8x32xf32>
    %223 = arith.addf %222, %217 : vector<8x32xf32>
    %224 = arith.negf %223 : vector<8x32xf32>
    %225 = math.exp %224 : vector<8x32xf32>
    %cst_69 = arith.constant 1.000000e+00 : f32
    %226 = vector.broadcast %cst_69 : f32 to vector<8x32xf32>
    %227 = arith.addf %226, %225 : vector<8x32xf32>
    %228 = arith.divf %226, %227 : vector<8x32xf32>
    %229 = vector.extract_strided_slice %10 {offsets = [56, 0], sizes = [8, 32], strides = [1, 1]} : vector<64x32xf32> to vector<8x32xf32>
    %230 = arith.addf %229, %218 : vector<8x32xf32>
    %231 = arith.negf %230 : vector<8x32xf32>
    %232 = math.exp %231 : vector<8x32xf32>
    %cst_70 = arith.constant 1.000000e+00 : f32
    %233 = vector.broadcast %cst_70 : f32 to vector<8x32xf32>
    %234 = arith.addf %233, %232 : vector<8x32xf32>
    %235 = arith.divf %233, %234 : vector<8x32xf32>
    %236 = vector.extract_strided_slice %15 {offsets = [56, 0], sizes = [8, 32], strides = [1, 1]} : vector<64x32xf32> to vector<8x32xf32>
    %237 = arith.mulf %228, %221 : vector<8x32xf32>
    %238 = arith.addf %236, %237 : vector<8x32xf32>
    %239 = math.tanh %238 : vector<8x32xf32>
    %cst_71 = arith.constant 1.000000e+00 : f32
    %240 = vector.broadcast %cst_71 : f32 to vector<8x32xf32>
    %241 = arith.subf %240, %235 : vector<8x32xf32>
    %242 = arith.mulf %241, %239 : vector<8x32xf32>
    %243 = arith.mulf %235, %216 : vector<8x32xf32>
    %244 = arith.addf %242, %243 : vector<8x32xf32>
    %c0_72 = arith.constant 0 : index
    %c0_73 = arith.constant 0 : index
    %245 = vector.load %arg11[%c0_72, %c0_73] : memref<1x32xf32, #tpu.memory_space<vmem>>, vector<1x32xf32>
    %246 = vector.broadcast %245 : vector<1x32xf32> to vector<8x32xf32>
    %247 = arith.mulf %244, %246 : vector<8x32xf32>
    %c0_74 = arith.constant 0 : index
    %c0_75 = arith.constant 0 : index
    %248 = vector.load %arg12[%c0_74, %c0_75] : memref<1x32xf32, #tpu.memory_space<vmem>>, vector<1x32xf32>
    %249 = vector.broadcast %248 : vector<1x32xf32> to vector<8x32xf32>
    %250 = arith.addf %247, %249 : vector<8x32xf32>
    %c0_76 = arith.constant 0 : index
    %c0_77 = arith.constant 0 : index
    %251 = vector.load %arg13[%c0_76, %c0_77] : memref<32x15xf32, #tpu.memory_space<vmem>>, vector<32x15xf32>
    %cst_78 = arith.constant dense<0.000000e+00> : vector<8x15xf32>
    %252 = tpu.matmul %250, %251, %cst_78 {dimension_numbers = #tpu.dot_dimension_numbers<[1], [0], [0], [1], [0, 0, 1, 1], [], []>} : vector<8x32xf32>, vector<32x15xf32>, vector<8x15xf32> -> vector<8x15xf32>
    %c0_79 = arith.constant 0 : index
    %c0_80 = arith.constant 0 : index
    %253 = vector.load %arg14[%c0_79, %c0_80] : memref<1x15xf32, #tpu.memory_space<vmem>>, vector<1x15xf32>
    %254 = vector.broadcast %253 : vector<1x15xf32> to vector<8x15xf32>
    %255 = arith.addf %252, %254 : vector<8x15xf32>
    %cst_81 = arith.constant 0.000000e+00 : f32
    %256 = vector.broadcast %cst_81 : f32 to vector<8x15xf32>
    %257 = arith.cmpf ogt, %255, %256 : vector<8x15xf32>
    %cst_82 = arith.constant 0.000000e+00 : f32
    %258 = vector.broadcast %cst_82 : f32 to vector<8x15xf32>
    %259 = arith.minimumf %255, %258 : vector<8x15xf32>
    %260 = math.exp %259 : vector<8x15xf32>
    %cst_83 = arith.constant 1.000000e+00 : f32
    %261 = vector.broadcast %cst_83 : f32 to vector<8x15xf32>
    %262 = arith.subf %260, %261 : vector<8x15xf32>
    %263 = arith.select %257, %255, %262 : vector<8x15xi1>, vector<8x15xf32>
    %c0_84 = arith.constant 0 : index
    %c0_85 = arith.constant 0 : index
    %264 = vector.load %arg15[%c0_84, %c0_85] : memref<15x2xf32, #tpu.memory_space<vmem>>, vector<15x2xf32>
    %cst_86 = arith.constant dense<0.000000e+00> : vector<8x2xf32>
    %265 = tpu.matmul %263, %264, %cst_86 {dimension_numbers = #tpu.dot_dimension_numbers<[1], [0], [0], [1], [0, 0, 1, 1], [], []>} : vector<8x15xf32>, vector<15x2xf32>, vector<8x2xf32> -> vector<8x2xf32>
    %c0_87 = arith.constant 0 : index
    %c0_88 = arith.constant 0 : index
    %266 = vector.load %arg16[%c0_87, %c0_88] : memref<1x2xf32, #tpu.memory_space<vmem>>, vector<1x2xf32>
    %267 = vector.broadcast %266 : vector<1x2xf32> to vector<8x2xf32>
    %268 = arith.addf %265, %267 : vector<8x2xf32>
    %269 = vector.extract_strided_slice %268 {offsets = [0, 0], sizes = [2, 2], strides = [1, 1]} : vector<8x2xf32> to vector<2x2xf32>
    %270 = arith.negf %269 : vector<2x2xf32>
    %271 = math.exp %270 : vector<2x2xf32>
    %cst_89 = arith.constant 1.000000e+00 : f32
    %272 = vector.broadcast %cst_89 : f32 to vector<2x2xf32>
    %273 = arith.addf %272, %271 : vector<2x2xf32>
    %274 = arith.divf %272, %273 : vector<2x2xf32>
    %c0_90 = arith.constant 0 : index
    %c0_91 = arith.constant 0 : index
    %275 = vector.load %arg17[%c0_90, %c0_91] : memref<2x2xf32, #tpu.memory_space<vmem>>, vector<2x2xf32>
    tpu.vector_store %arg17[%c0_90, %c0_91], %274 {strides = array<i32>} : memref<2x2xf32, #tpu.memory_space<vmem>>, vector<2x2xf32>,
    return
  }
}

</mosaic_0001>

<bundles_post_ra>
// kernel: tpu_custom_call.1
= control target key start
LH: loop header
LB: loop body
LE: loop exit
PB: predicated region body
PF: predicated region fallthrough
CT: control target
= control target key end

     0   :  { %s1940_s0 = inlined_call_operand.vmem [shape: f32[64,4], index: 0, kind: input, shape index: {}]   ;;  %s1941_s1 = inlined_call_operand.vmem [shape: f32[4,32], index: 1, kind: input, shape index: {}]   ;;  %s1942_s2 = inlined_call_operand.vmem [shape: f32[4,32], index: 2, kind: input, shape index: {}]   ;;  %s1943_s3 = inlined_call_operand.vmem [shape: f32[4,32], index: 3, kind: input, shape index: {}]   ;;  %s1944_s4 = inlined_call_operand.vmem [shape: f32[32,32], index: 4, kind: input, shape index: {}]   ;;  %s1945_s5 = inlined_call_operand.vmem [shape: f32[32,32], index: 5, kind: input, shape index: {}]   ;;  %s1946_s6 = inlined_call_operand.vmem [shape: f32[32,32], index: 6, kind: input, shape index: {}]   ;;  %s1947_s7 = inlined_call_operand.vmem [shape: f32[1,32], index: 7, kind: input, shape index: {}]   ;;  %s1948_s8 = inlined_call_operand.vmem [shape: f32[1,32], index: 8, kind: input, shape index: {}]   ;;  %s1949_s9 = inlined_call_operand.vmem [shape: f32[1,32], index: 9, kind: input, shape index: {}]   ;;  %s1950_s10 = inlined_call_operand.vmem [shape: f32[1,32], index: 10, kind: input, shape index: {}]   ;;  %s1951_s11 = inlined_call_operand.vmem [shape: f32[1,32], index: 11, kind: input, shape index: {}]   ;;  %s1952_s12 = inlined_call_operand.vmem [shape: f32[1,32], index: 12, kind: input, shape index: {}]   ;;  %s1953_s13 = inlined_call_operand.vmem [shape: f32[32,15], index: 13, kind: input, shape index: {}]   ;;  %s1954_s14 = inlined_call_operand.vmem [shape: f32[1,15], index: 14, kind: input, shape index: {}]   ;;  %s1955_s15 = inlined_call_operand.vmem [shape: f32[15,2], index: 15, kind: input, shape index: {}]   ;;  %s1956_s16 = inlined_call_operand.vmem [shape: f32[1,2], index: 16, kind: input, shape index: {}]   ;;  %s1957_s17 = inlined_call_operand.hbm [shape: f32[2,2], index: 17, kind: output, shape index: {}]  }
   0x1   :  { %1959 = sst [smem:[#allocation5_spill]] %s1940_s0 }
   0x2   :  { %1960 = sst [smem:[#allocation6_spill]] %s1941_s1 }
   0x3   :  { %v1543_v0 = vld [vmem:[%s1944_s4 + $0x18] sm:$0xff]  ;;  %v1548_v1 = vld [vmem:[%s1944_s4 + $0x10] sm:$0xff]  ;;  %vm95_vm0 = vcmask 1043456   ;;  %vm70_vm1 = vcmask 31744   ;;  %s1961_s0 = sld [smem:[#allocation6_spill]]  ;;  %v1557_v3 = vld [vmem:[%s1944_s4 + $0x8] sm:$0xff] }
   0x4   :  { %267 = vmatpush.msra.mxu3 %v1543_v0  ;;  %s1962_s20 = sld [smem:[#allocation5_spill]]  ;;  %v140_v5 = vld [vmem:[%s1942_s2] sm:$0xf]  ;;  %v1571_v6 = vld [vmem:[%s1946_s6 + $0x18] sm:$0xff]  ;;  %v1587_v9 = vld [vmem:[%s1946_s6 + $0x10] sm:$0xff]  ;;  %v1448_v12 = vmov 0.0  }
   0x5   :  { %v1576_v7 = vld [vmem:[%s1944_s4] sm:$0xff]  ;;  %v1581_v8 = vld [vmem:[%s1945_s5 + $0x18] sm:$0xff]  ;;  %1262 = vmatpush.msk.msra.mxu1 %vm95_vm0, %v140_v5  ;;  %v1595_v10 = vld [vmem:[%s1946_s6 + $0x8] sm:$0xff] }
   0x6   :  { %268 = vmatpush.msra.mxu3 %v1548_v1  ;;  %v189_v11 = vld [vmem:[%s1943_s3] sm:$0xf]  ;;  %v1607_v13 = vld [vmem:[%s1945_s5 + $0x10] sm:$0xff] }
   0x7   :  { %1271 = vmatpush.msk.msra.mxu2 %vm95_vm0, %v189_v11 }
   0x8   :  { %269 = vmatpush.msra.mxu3 %v1557_v3 }
   0x9   :  { %v65_v2 = vld [vmem:[%s1961_s0] sm:$0xf] }
   0xa   :  { %1253 = vmatpush.msk.msra.mxu0 %vm95_vm0, %v65_v2  ;;  %v57_v4 = vld [vmem:[%s1962_s20] sm:$0xff]  ;;  %270 = vmatpush.msra.mxu3 %v1576_v7 }
   0xb   :  { %1254 = vmatmul.msk.f32.vlgmr.msra.gmra.mxu0 %vm70_vm1, %v57_v4  ;;  %1263 = vmatmul.msk.f32.vlgmr.msra.gmra.mxu1 %vm70_vm1, %v57_v4 }
   0xc   :  { %530 = vmatpush.msrb.mxu0 %v1571_v6  ;;  %1272 = vmatmul.msk.f32.vlgmr.msra.gmra.mxu2 %vm70_vm1, %v57_v4 }
   0xd   :  { %271 = vmatmul.f32.vlgmr.msra.gmra.mxu3 %v1448_v12 }
   0xe   :  { %531 = vmatpush.msrb.mxu0 %v1587_v9 }
  0x10   :  { %532 = vmatpush.msrb.mxu0 %v1595_v10 }
  0x11   :  { %22 = vsyncpa [#allocation3], 0  ;;  %287 = vmatpush.msrb.mxu3 %v1581_v8  ;;  %v1614_v14 = vld [vmem:[%s1946_s6] sm:$0xff]  ;;  %600 = vmatpush.msrb.mxu1 %v1543_v0  ;;  %v1620_v15 = vld [vmem:[%s1945_s5 + $0x8] sm:$0xff]  ;;  %vm251_vm10 = vcmask 261120  }
  0x12   :  { %533 = vmatpush.msrb.mxu0 %v1614_v14  ;;  %620 = vmatpush.msrb.mxu2 %v1581_v8  ;;  %v1629_v16 = vld [vmem:[%s1945_s5] sm:$0xff]  ;;  %v58_v31 = vld [vmem:[%s1962_s20 + $0x8] sm:$0xff]  ;;  %v59_v11 = vld [vmem:[%s1962_s20 + $0x10] sm:$0xff] }
  0x13   :  { %288 = vmatpush.msrb.mxu3 %v1607_v13  ;;  %601 = vmatpush.msrb.mxu1 %v1548_v1  ;;  %v1665_v17 = vld [vmem:[%s1947_s7] ss:$0 sm:$0xff] }
  0x14   :  { %621 = vmatpush.msrb.mxu2 %v1607_v13  ;;  %710 = vmatpush.msra.mxu0 %v1543_v0  ;;  %v1671_v22 = vld [vmem:[%s1948_s8] ss:$0 sm:$0xff] }
  0x15   :  { %289 = vmatpush.msrb.mxu3 %v1620_v15  ;;  %602 = vmatpush.msrb.mxu1 %v1557_v3  ;;  %v1683_v36 = vld [vmem:[%s1950_s10] ss:$0 sm:$0xff] }
  0x16   :  { %622 = vmatpush.msrb.mxu2 %v1620_v15  ;;  %711 = vmatpush.msra.mxu0 %v1548_v1  ;;  %v1688_v42 = vld [vmem:[%s1949_s9] ss:$0 sm:$0xff] }
  0x17   :  { %290 = vmatpush.msrb.mxu3 %v1629_v16  ;;  %603 = vmatpush.msrb.mxu1 %v1576_v7 }
  0x18   :  { %291 = vmatmul.f32.vlgmr.msrb.gmra.mxu3 %v1448_v12  ;;  %623 = vmatpush.msrb.mxu2 %v1629_v16 }
  0x19   :  { %310 = vmatpush.msra.mxu3 %v1571_v6  ;;  %730 = vmatpush.msra.mxu1 %v1581_v8 }
  0x1a   :  { %750 = vmatpush.msra.mxu2 %v1571_v6  ;;  %712 = vmatpush.msra.mxu0 %v1557_v3 }
  0x1b   :  { %311 = vmatpush.msra.mxu3 %v1587_v9  ;;  %731 = vmatpush.msra.mxu1 %v1607_v13 }
  0x1c   :  { %751 = vmatpush.msra.mxu2 %v1587_v9  ;;  %713 = vmatpush.msra.mxu0 %v1576_v7 }
  0x1d   :  { %312 = vmatpush.msra.mxu3 %v1595_v10  ;;  %732 = vmatpush.msra.mxu1 %v1620_v15 }
  0x1e   :  { %752 = vmatpush.msra.mxu2 %v1595_v10  ;;  %1255 = vmatmul.msk.f32.gmra.mxu0 %vm70_vm1, %v58_v31 }
  0x1f   :  { %313 = vmatpush.msra.mxu3 %v1614_v14  ;;  %733 = vmatpush.msra.mxu1 %v1629_v16 }
  0x20   :  { %314 = vmatmul.f32.vlgmr.msra.gmra.mxu3 %v1448_v12  ;;  %753 = vmatpush.msra.mxu2 %v1614_v14  ;;  %v60_v12 = vld [vmem:[%s1962_s20 + $0x18] sm:$0xff] }
  0x21   :  { %380 = vmatpush.msrb.mxu3 %v1543_v0  ;;  %1264 = vmatmul.msk.f32.gmra.mxu1 %vm70_vm1, %v58_v31 }
  0x22   :  { %1273 = vmatmul.msk.f32.gmra.mxu2 %vm70_vm1, %v58_v31 }
  0x23   :  { %381 = vmatpush.msrb.mxu3 %v1548_v1 }
  0x25   :  { %382 = vmatpush.msrb.mxu3 %v1557_v3 }
  0x26   :  { %1256 = vmatmul.msk.f32.gmra.mxu0 %vm70_vm1, %v59_v11 }
  0x27   :  { %383 = vmatpush.msrb.mxu3 %v1576_v7 }
  0x29   :  { %400 = vmatpush.msra.mxu3 %v1581_v8  ;;  %1265 = vmatmul.msk.f32.gmra.mxu1 %vm70_vm1, %v59_v11 }
  0x2a   :  { %1274 = vmatmul.msk.f32.gmra.mxu2 %vm70_vm1, %v59_v11 }
  0x2b   :  { %401 = vmatpush.msra.mxu3 %v1607_v13 }
  0x2d   :  { %402 = vmatpush.msra.mxu3 %v1620_v15 }
  0x2e   :  { %1257 = vmatmul.msk.f32.gmra.mxu0 %vm70_vm1, %v60_v12 }
  0x2f   :  { %403 = vmatpush.msra.mxu3 %v1629_v16 }
  0x31   :  { %1266 = vmatmul.msk.f32.gmra.mxu1 %vm70_vm1, %v60_v12 }
  0x32   :  { %1275 = vmatmul.msk.f32.gmra.mxu2 %vm70_vm1, %v60_v12 }
  0x88   :  { %v116_v18 = vpop.f32.mrf.mxu0  ;;  %v165_v23 = vpop.f32.mrf.mxu1 }
  0x89   :  { %v117_v19 = vadd.f32 %v1665_v17, %v116_v18  ;;  %v166_v25 = vadd.f32 %v1671_v22, %v165_v23  ;;  %v61_v18 = vld [vmem:[%s1962_s20 + $0x20] sm:$0xff]  ;;  %v63_v23 = vld [vmem:[%s1962_s20 + $0x30] sm:$0xff] }
  0x8a   :  { %1258 = vmatmul.msk.f32.gmra.mxu0 %vm70_vm1, %v61_v18  ;;  %1267 = vmatmul.msk.f32.gmra.mxu1 %vm70_vm1, %v61_v18 }
  0x8b   :  { %1276 = vmatmul.msk.f32.gmra.mxu2 %vm70_vm1, %v61_v18 }
  0x8f   :  { %v214_v43 = vpop.f32.mrf.mxu2 }
  0x90   :  { %v272_v20 = vpop.f32.mrf.mxu3  ;;  %v215_v50 = vadd.f32 %v1688_v42, %v214_v43 }
  0x91   :  { %v318_v21 = vadd.f32 %v272_v20, %v117_v19  ;;  %v62_v19 = vld [vmem:[%s1962_s20 + $0x28] sm:$0xff] }
  0x92   :  { %1259 = vmatmul.msk.f32.gmra.mxu0 %vm70_vm1, %v62_v19  ;;  %1268 = vmatmul.msk.f32.gmra.mxu1 %vm70_vm1, %v62_v19 }
  0x93   :  { %v1280_v24 = vmul.f32 -1.442695, %v318_v21  ;;  %1277 = vmatmul.msk.f32.gmra.mxu2 %vm70_vm1, %v62_v19 }
  0x95   :  { %1332 = vpow2.f32 %v1280_v24 }
  0x9a   :  { %1260 = vmatmul.msk.f32.gmra.mxu0 %vm70_vm1, %v63_v23  ;;  %1269 = vmatmul.msk.f32.gmra.mxu1 %vm70_vm1, %v63_v23 }
  0x9b   :  { %v292_v26 = vpop.f32.mrf.mxu3  ;;  %v1333_v28 = vpop.eup %1332  ;;  %1278 = vmatmul.msk.f32.gmra.mxu2 %vm70_vm1, %v63_v23 }
  0x9c   :  { %v338_v27 = vadd.f32 %v292_v26, %v166_v25  ;;  %v322_v30 = vadd.f32 1.0, %v1333_v28  ;;  %v119_v20 = vpop.f32.mrf.mxu0 }
  0x9d   :  { %v120_v21 = vadd.f32 %v1665_v17, %v119_v20 }
  0x9e   :  { %v1281_v29 = vmul.f32 -1.442695, %v338_v27  ;;  %v334_v39 = vand.u32 2147483648, %v322_v30  ;;  %v332_v41 = vand.u32 2147483647, %v322_v30  ;;  %vm328_vm3 = vweird.f32 %v322_v30  ;;  %v168_v26 = vpop.f32.mrf.mxu1 }
  0x9f   :  { %v169_v28 = vadd.f32 %v1671_v22, %v168_v26 }
  0xa0   :  { %1334 = vpow2.f32 %v1281_v29  ;;  %v335_v47 = vor.u32 1.1754944e-38, %v334_v39  ;;  %vm333_vm5 = vcmp.eq.f32.partialorder %v332_v41, 8.507059e+37  ;;  %v64_v29 = vld [vmem:[%s1962_s20 + $0x38] sm:$0xff] }
  0xa1   :  { %1336 = vrcp.f32 %v322_v30 }
  0xa2   :  { %1261 = vmatmul.msk.f32.gmra.mxu0 %vm70_vm1, %v64_v29  ;;  %1270 = vmatmul.msk.f32.gmra.mxu1 %vm70_vm1, %v64_v29 }
  0xa3   :  { %v315_v38 = vpop.f32.mrf.mxu3  ;;  %1279 = vmatmul.msk.f32.gmra.mxu2 %vm70_vm1, %v64_v29 }
  0xa4   :  { %v316_v44 = vadd.f32 %v1683_v36, %v315_v38 }
  0xa6   :  { %v1335_v32 = vpop.eup %1334 }
  0xa7   :  { %v1337_v33 = vpop.eup %1336  ;;  %v342_v34 = vadd.f32 1.0, %v1335_v32 }
  0xa8   :  { %v324_v35 = vmul.f32 %v1337_v33, %v322_v30  ;;  %vm329_vm2 = vweird.f32 %v1337_v33 }
  0xa9   :  { %1338 = vrcp.f32 %v342_v34  ;;  %vm330_vm4 = vmor %vm328_vm3, %vm329_vm2  ;;  %v354_v54 = vand.u32 2147483648, %v342_v34  ;;  %v352_v56 = vand.u32 2147483647, %v342_v34  ;;  %vm348_vm7 = vweird.f32 %v342_v34 }
  0xaa   :  { %v325_v37 = vsub.f32 1.0, %v324_v35 }
  0xab   :  { %v355_v59 = vor.u32 1.1754944e-38, %v354_v54  ;;  %vm353_vm9 = vcmp.eq.f32.partialorder %v352_v56, 8.507059e+37 }
  0xac   :  { %v326_v40 = vmul.f32 %v1337_v33, %v325_v37 }
  0xae   :  { %v327_v45 = vadd.f32 %v1337_v33, %v326_v40 }
  0xaf   :  { %v1339_v46 = vpop.eup %1338 }
  0xb0   :  { %v344_v48 = vmul.f32 %v1339_v46, %v342_v34  ;;  %v331_v49 = vsel %vm330_vm4, %v1337_v33, %v327_v45  ;;  %vm349_vm6 = vweird.f32 %v1339_v46  ;;  %v217_v45 = vpop.f32.mrf.mxu2 }
  0xb1   :  { %v336_v51 = vsel %vm333_vm5, %v335_v47, %v331_v49  ;;  %vm350_vm8 = vmor %vm348_vm7, %vm349_vm6 }
  0xb2   :  { %v345_v52 = vsub.f32 1.0, %v344_v48  ;;  %v358_v53 = vmul.f32 %v336_v51, %v316_v44 }
  0xb4   :  { %v346_v55 = vmul.f32 %v1339_v46, %v345_v52  ;;  %v359_v57 = vadd.f32 %v358_v53, %v215_v50  ;;  %v218_v50 = vadd.f32 %v1688_v42, %v217_v45 }
  0xb6   :  { %v347_v58 = vadd.f32 %v1339_v46, %v346_v55  ;;  %1340 = vtanh.f32 %v359_v57 }
  0xb8   :  { %v351_v60 = vsel %vm350_vm8, %v1339_v46, %v347_v58 }
  0xb9   :  { %v356_v61 = vsel %vm353_vm9, %v355_v59, %v351_v60 }
  0xba   :  { %v361_v62 = vsub.f32 1.0, %v356_v61  ;;  %v363_v4 = vmul.f32 0.0, %v356_v61 }
  0xbc   :  { %v1341_v63 = vpop.eup %1340 }
  0xbd   :  { %v362_v2 = vmul.f32 %v1341_v63, %v361_v62 }
  0xbf   :  { %v1692_v5 = vadd.f32 %v363_v4, %v362_v2 }
  0xc1   :  { %1282 = vmatmul.msk.f32.vlgmr.msrb.gmra.mxu3 %vm251_vm10, %v1692_v5 }
  0xc2   :  { %420 = vmatpush.msrb.mxu3 %v1571_v6 }
  0xc4   :  { %421 = vmatpush.msrb.mxu3 %v1587_v9 }
  0xc6   :  { %422 = vmatpush.msrb.mxu3 %v1595_v10 }
  0xc8   :  { %423 = vmatpush.msrb.mxu3 %v1614_v14 }
  0xc9   :  { %1283 = vmatmul.msk.f32.vlgmr.msra.gmra.mxu3 %vm251_vm10, %v1692_v5 }
  0xca   :  { %490 = vmatpush.msra.mxu3 %v1543_v0 }
  0xcc   :  { %491 = vmatpush.msra.mxu3 %v1548_v1 }
  0xce   :  { %492 = vmatpush.msra.mxu3 %v1557_v3 }
  0xd0   :  { %493 = vmatpush.msra.mxu3 %v1576_v7 }
  0xd1   :  { %1284 = vmatmul.msk.f32.vlgmr.msrb.gmra.mxu3 %vm251_vm10, %v1692_v5 }
  0xd2   :  { %510 = vmatpush.msrb.mxu3 %v1581_v8 }
  0xd4   :  { %511 = vmatpush.msrb.mxu3 %v1607_v13 }
  0xd6   :  { %512 = vmatpush.msrb.mxu3 %v1620_v15 }
  0xd8   :  { %513 = vmatpush.msrb.mxu3 %v1629_v16 }
 0x144   :  { %v385_v24 = vpop.f32.mrf.mxu3 }
 0x145   :  { %v428_v25 = vadd.f32 %v385_v24, %v120_v21 }
 0x147   :  { %v1285_v27 = vmul.f32 -1.442695, %v428_v25 }
 0x149   :  { %1342 = vpow2.f32 %v1285_v27  ;;  %v171_v27 = vpop.f32.mrf.mxu1 }
 0x14c   :  { %v405_v30 = vpop.f32.mrf.mxu3 }
 0x14d   :  { %v448_v31 = vadd.f32 %v405_v30, %v169_v28  ;;  %v172_v30 = vadd.f32 %v1671_v22, %v171_v27 }
 0x14f   :  { %v1343_v32 = vpop.eup %1342  ;;  %v1286_v33 = vmul.f32 -1.442695, %v448_v31 }
 0x150   :  { %v432_v34 = vadd.f32 1.0, %v1343_v32 }
 0x151   :  { %1344 = vpow2.f32 %v1286_v33 }
 0x152   :  { %1346 = vrcp.f32 %v432_v34  ;;  %v444_v41 = vand.u32 2147483648, %v432_v34  ;;  %v442_v44 = vand.u32 2147483647, %v432_v34  ;;  %vm438_vm12 = vweird.f32 %v432_v34 }
 0x154   :  { %v425_v46 = vpop.f32.mrf.mxu3  ;;  %v445_v49 = vor.u32 1.1754944e-38, %v444_v41  ;;  %vm443_vm14 = vcmp.eq.f32.partialorder %v442_v44, 8.507059e+37 }
 0x155   :  { %v426_v52 = vadd.f32 %v1683_v36, %v425_v46 }
 0x157   :  { %v1345_v35 = vpop.eup %1344 }
 0x158   :  { %v1347_v37 = vpop.eup %1346  ;;  %v452_v38 = vadd.f32 1.0, %v1345_v35 }
 0x159   :  { %v434_v39 = vmul.f32 %v1347_v37, %v432_v34  ;;  %vm439_vm11 = vweird.f32 %v1347_v37 }
 0x15a   :  { %1348 = vrcp.f32 %v452_v38  ;;  %vm440_vm13 = vmor %vm438_vm12, %vm439_vm11  ;;  %v464_v57 = vand.u32 2147483648, %v452_v38  ;;  %v462_v59 = vand.u32 2147483647, %v452_v38  ;;  %vm458_vm0 = vweird.f32 %v452_v38 }
 0x15b   :  { %v435_v40 = vsub.f32 1.0, %v434_v39 }
 0x15c   :  { %v465_v62 = vor.u32 1.1754944e-38, %v464_v57  ;;  %vm463_vm2 = vcmp.eq.f32.partialorder %v462_v59, 8.507059e+37 }
 0x15d   :  { %v436_v43 = vmul.f32 %v1347_v37, %v435_v40 }
 0x15f   :  { %v437_v47 = vadd.f32 %v1347_v37, %v436_v43 }
 0x160   :  { %v1349_v48 = vpop.eup %1348 }
 0x161   :  { %v454_v51 = vmul.f32 %v1349_v48, %v452_v38  ;;  %v441_v53 = vsel %vm440_vm13, %v1347_v37, %v437_v47  ;;  %vm459_vm15 = vweird.f32 %v1349_v48 }
 0x162   :  { %v446_v54 = vsel %vm443_vm14, %v445_v49, %v441_v53  ;;  %vm460_vm1 = vmor %vm458_vm0, %vm459_vm15 }
 0x163   :  { %v455_v55 = vsub.f32 1.0, %v454_v51  ;;  %v468_v56 = vmul.f32 %v446_v54, %v426_v52 }
 0x165   :  { %v456_v58 = vmul.f32 %v1349_v48, %v455_v55  ;;  %v469_v60 = vadd.f32 %v468_v56, %v218_v50 }
 0x167   :  { %v457_v61 = vadd.f32 %v1349_v48, %v456_v58  ;;  %1350 = vtanh.f32 %v469_v60 }
 0x169   :  { %v461_v63 = vsel %vm460_vm1, %v1349_v48, %v457_v61  ;;  %v220_v48 = vpop.f32.mrf.mxu2 }
 0x16a   :  { %v466_v2 = vsel %vm463_vm2, %v465_v62, %v461_v63  ;;  %v221_v54 = vadd.f32 %v1688_v42, %v220_v48 }
 0x16b   :  { %v471_v4 = vsub.f32 1.0, %v466_v2  ;;  %v473_v18 = vmul.f32 %v466_v2, %v1692_v5  ;;  %v122_v5 = vpop.f32.mrf.mxu0 }
 0x16c   :  { %v123_v24 = vadd.f32 %v1665_v17, %v122_v5 }
 0x16d   :  { %v1351_v11 = vpop.eup %1350 }
 0x16e   :  { %v472_v12 = vmul.f32 %v1351_v11, %v471_v4 }
 0x170   :  { %v1753_v19 = vadd.f32 %v473_v18, %v472_v12 }
 0x172   :  { %1287 = vmatmul.msk.f32.vlgmr.msra.gmra.mxu3 %vm251_vm10, %v1753_v19  ;;  %1289 = vmatmul.msk.f32.vlgmr.msrb.gmra.mxu0 %vm251_vm10, %v1753_v19 }
 0x173   :  { %640 = vmatpush.msra.mxu3 %v1571_v6  ;;  %840 = vmatpush.msrb.mxu0 %v1581_v8  ;;  %v1773_v20 = vpop.f32.mrf.mxu0 }
 0x175   :  { %641 = vmatpush.msra.mxu3 %v1587_v9  ;;  %841 = vmatpush.msrb.mxu0 %v1607_v13 }
 0x177   :  { %642 = vmatpush.msra.mxu3 %v1595_v10  ;;  %842 = vmatpush.msrb.mxu0 %v1620_v15 }
 0x179   :  { %643 = vmatpush.msra.mxu3 %v1614_v14  ;;  %843 = vmatpush.msrb.mxu0 %v1629_v16 }
 0x17a   :  { %1288 = vmatmul.msk.f32.vlgmr.msrb.gmra.mxu3 %vm251_vm10, %v1753_v19 }
 0x17b   :  { %820 = vmatpush.msrb.mxu3 %v1543_v0  ;;  %v1775_v21 = vpop.f32.mrf.mxu0 }
 0x17d   :  { %821 = vmatpush.msrb.mxu3 %v1548_v1 }
 0x17f   :  { %822 = vmatpush.msrb.mxu3 %v1557_v3 }
 0x181   :  { %823 = vmatpush.msrb.mxu3 %v1576_v7 }
 0x183   :  { %v1777_v23 = vpop.f32.mrf.mxu0 }
 0x18b   :  { %v1780_v29 = vpop.f32.mrf.mxu0 }
 0x193   :  { %v1783_v37 = vpop.f32.mrf.mxu0 }
 0x1ef   :  { %v535_v45 = vpop.f32.mrf.mxu0 }
 0x1f0   :  { %v536_v51 = vadd.f32 %v1683_v36, %v535_v45 }
 0x1f5   :  { %v495_v25 = vpop.f32.mrf.mxu3 }
 0x1f6   :  { %v538_v26 = vadd.f32 %v495_v25, %v123_v24 }
 0x1f8   :  { %v1290_v28 = vmul.f32 -1.442695, %v538_v26  ;;  %v223_v26 = vpop.f32.mrf.mxu2 }
 0x1fa   :  { %1352 = vpow2.f32 %v1290_v28 }
 0x1fd   :  { %v515_v31 = vpop.f32.mrf.mxu3 }
 0x1fe   :  { %v558_v32 = vadd.f32 %v515_v31, %v172_v30 }
 0x200   :  { %v1353_v33 = vpop.eup %1352  ;;  %v1291_v34 = vmul.f32 -1.442695, %v558_v32  ;;  %v1810_v28 = vpop.f32.mrf.mxu2 }
 0x201   :  { %v542_v35 = vadd.f32 1.0, %v1353_v33 }
 0x202   :  { %1354 = vpow2.f32 %v1291_v34 }
 0x203   :  { %1356 = vrcp.f32 %v542_v35  ;;  %v554_v44 = vand.u32 2147483648, %v542_v35  ;;  %v552_v47 = vand.u32 2147483647, %v542_v35  ;;  %vm548_vm4 = vweird.f32 %v542_v35 }
 0x205   :  { %v555_v52 = vor.u32 1.1754944e-38, %v554_v44  ;;  %vm553_vm6 = vcmp.eq.f32.partialorder %v552_v47, 8.507059e+37 }
 0x208   :  { %v1355_v38 = vpop.eup %1354  ;;  %v1814_v31 = vpop.f32.mrf.mxu2 }
 0x209   :  { %v1357_v39 = vpop.eup %1356  ;;  %v562_v40 = vadd.f32 1.0, %v1355_v38  ;;  %v126_v38 = vadd.f32 %v1665_v17, %v1773_v20 }
 0x20a   :  { %v544_v41 = vmul.f32 %v1357_v39, %v542_v35  ;;  %vm549_vm3 = vweird.f32 %v1357_v39 }
 0x20b   :  { %1358 = vrcp.f32 %v562_v40  ;;  %vm550_vm5 = vmor %vm548_vm4, %vm549_vm3  ;;  %v574_v59 = vand.u32 2147483648, %v562_v40  ;;  %v572_v62 = vand.u32 2147483647, %v562_v40  ;;  %vm568_vm8 = vweird.f32 %v562_v40 }
 0x20c   :  { %v545_v43 = vsub.f32 1.0, %v544_v41 }
 0x20d   :  { %v575_v2 = vor.u32 1.1754944e-38, %v574_v59  ;;  %vm573_vm11 = vcmp.eq.f32.partialorder %v572_v62, 8.507059e+37 }
 0x20e   :  { %v546_v46 = vmul.f32 %v1357_v39, %v545_v43 }
 0x210   :  { %v547_v49 = vadd.f32 %v1357_v39, %v546_v46  ;;  %v1818_v33 = vpop.f32.mrf.mxu2 }
 0x211   :  { %v1359_v50 = vpop.eup %1358 }
 0x212   :  { %v564_v53 = vmul.f32 %v1359_v50, %v562_v40  ;;  %v551_v55 = vsel %vm550_vm5, %v1357_v39, %v547_v49  ;;  %vm569_vm7 = vweird.f32 %v1359_v50 }
 0x213   :  { %v556_v56 = vsel %vm553_vm6, %v555_v52, %v551_v55  ;;  %vm570_vm9 = vmor %vm568_vm8, %vm569_vm7 }
 0x214   :  { %v565_v57 = vsub.f32 1.0, %v564_v53  ;;  %v578_v58 = vmul.f32 %v556_v56, %v536_v51 }
 0x216   :  { %v566_v60 = vmul.f32 %v1359_v50, %v565_v57  ;;  %v579_v61 = vadd.f32 %v578_v58, %v221_v54 }
 0x218   :  { %1360 = vtanh.f32 %v579_v61  ;;  %v567_v63 = vadd.f32 %v1359_v50, %v566_v60  ;;  %v1822_v35 = vpop.f32.mrf.mxu2 }
 0x21a   :  { %v571_v4 = vsel %vm570_vm9, %v1359_v50, %v567_v63 }
 0x21b   :  { %v576_v11 = vsel %vm573_vm11, %v575_v2, %v571_v4  ;;  %v224_v2 = vadd.f32 %v1688_v42, %v223_v26 }
 0x21c   :  { %v581_v12 = vsub.f32 1.0, %v576_v11  ;;  %v583_v24 = vmul.f32 %v576_v11, %v1753_v19  ;;  %v174_v19 = vpop.f32.mrf.mxu1 }
 0x21d   :  { %v175_v43 = vadd.f32 %v1671_v22, %v174_v19 }
 0x21e   :  { %v1361_v18 = vpop.eup %1360 }
 0x21f   :  { %v582_v5 = vmul.f32 %v1361_v18, %v581_v12 }
 0x221   :  { %v1788_v25 = vadd.f32 %v583_v24, %v582_v5 }
 0x223   :  { %1292 = vmatmul.msk.f32.vlgmr.msrb.gmra.mxu1 %vm251_vm10, %v1788_v25  ;;  %1293 = vmatmul.msk.f32.vlgmr.msrb.gmra.mxu2 %vm251_vm10, %v1788_v25 }
 0x224   :  { %1294 = vmatmul.msk.f32.vlgmr.msra.gmra.mxu3 %vm251_vm10, %v1788_v25  ;;  %860 = vmatpush.msrb.mxu1 %v1571_v6  ;;  %v1808_v27 = vpop.f32.mrf.mxu1 }
 0x225   :  { %930 = vmatpush.msrb.mxu2 %v1543_v0  ;;  %950 = vmatpush.msra.mxu3 %v1581_v8 }
 0x226   :  { %861 = vmatpush.msrb.mxu1 %v1587_v9 }
 0x227   :  { %931 = vmatpush.msrb.mxu2 %v1548_v1  ;;  %951 = vmatpush.msra.mxu3 %v1607_v13 }
 0x228   :  { %862 = vmatpush.msrb.mxu1 %v1595_v10 }
 0x229   :  { %932 = vmatpush.msrb.mxu2 %v1557_v3  ;;  %952 = vmatpush.msra.mxu3 %v1620_v15 }
 0x22a   :  { %863 = vmatpush.msrb.mxu1 %v1614_v14 }
 0x22b   :  { %933 = vmatpush.msrb.mxu2 %v1576_v7  ;;  %953 = vmatpush.msra.mxu3 %v1629_v16 }
 0x22c   :  { %v1812_v30 = vpop.f32.mrf.mxu1 }
 0x234   :  { %v1816_v32 = vpop.f32.mrf.mxu1 }
 0x23c   :  { %v1820_v34 = vpop.f32.mrf.mxu1 }
 0x2a0   :  { %v605_v39 = vpop.f32.mrf.mxu1 }
 0x2a1   :  { %v648_v40 = vadd.f32 %v605_v39, %v126_v38 }
 0x2a3   :  { %v1295_v41 = vmul.f32 -1.442695, %v648_v40 }
 0x2a5   :  { %1362 = vpow2.f32 %v1295_v41 }
 0x2a6   :  { %v625_v44 = vpop.f32.mrf.mxu2 }
 0x2a7   :  { %v668_v45 = vadd.f32 %v625_v44, %v175_v43  ;;  %v645_v57 = vpop.f32.mrf.mxu3 }
 0x2a8   :  { %v646_v62 = vadd.f32 %v1683_v36, %v645_v57 }
 0x2a9   :  { %v1296_v46 = vmul.f32 -1.442695, %v668_v45 }
 0x2ab   :  { %v1363_v47 = vpop.eup %1362  ;;  %1364 = vpow2.f32 %v1296_v46 }
 0x2ac   :  { %v652_v48 = vadd.f32 1.0, %v1363_v47 }
 0x2ae   :  { %1366 = vrcp.f32 %v652_v48  ;;  %v664_v20 = vand.u32 2147483648, %v652_v48  ;;  %v662_v55 = vand.u32 2147483647, %v652_v48  ;;  %vm658_vm13 = vweird.f32 %v652_v48 }
 0x2b0   :  { %v665_v60 = vor.u32 1.1754944e-38, %v664_v20  ;;  %vm663_vm15 = vcmp.eq.f32.partialorder %v662_v55, 8.507059e+37 }
 0x2b1   :  { %v1365_v49 = vpop.eup %1364 }
 0x2b2   :  { %v672_v50 = vadd.f32 1.0, %v1365_v49 }
 0x2b4   :  { %v1367_v51 = vpop.eup %1366  ;;  %1368 = vrcp.f32 %v672_v50  ;;  %v684_v12 = vand.u32 2147483648, %v672_v50  ;;  %v682_v5 = vand.u32 2147483647, %v672_v50  ;;  %vm678_vm1 = vweird.f32 %v672_v50 }
 0x2b5   :  { %v654_v52 = vmul.f32 %v1367_v51, %v652_v48  ;;  %vm659_vm12 = vweird.f32 %v1367_v51 }
 0x2b6   :  { %vm660_vm14 = vmor %vm658_vm13, %vm659_vm12  ;;  %v685_v38 = vor.u32 1.1754944e-38, %v684_v12  ;;  %vm683_vm3 = vcmp.eq.f32.partialorder %v682_v5, 8.507059e+37 }
 0x2b7   :  { %v655_v53 = vsub.f32 1.0, %v654_v52 }
 0x2b9   :  { %v656_v54 = vmul.f32 %v1367_v51, %v655_v53 }
 0x2ba   :  { %v1369_v56 = vpop.eup %1368 }
 0x2bb   :  { %v674_v58 = vmul.f32 %v1369_v56, %v672_v50  ;;  %v657_v59 = vadd.f32 %v1367_v51, %v656_v54  ;;  %vm679_vm0 = vweird.f32 %v1369_v56 }
 0x2bc   :  { %vm680_vm2 = vmor %vm678_vm1, %vm679_vm0 }
 0x2bd   :  { %v675_v61 = vsub.f32 1.0, %v674_v58  ;;  %v661_v63 = vsel %vm660_vm14, %v1367_v51, %v657_v59 }
 0x2be   :  { %v666_v4 = vsel %vm663_vm15, %v665_v60, %v661_v63  ;;  %v227_v63 = vadd.f32 %v1688_v42, %v1810_v28  ;;  %v181_v28 = vadd.f32 %v1671_v22, %v1812_v30 }
 0x2bf   :  { %v676_v11 = vmul.f32 %v1369_v56, %v675_v61  ;;  %v688_v18 = vmul.f32 %v666_v4, %v646_v62 }
 0x2c1   :  { %v677_v24 = vadd.f32 %v1369_v56, %v676_v11  ;;  %v689_v19 = vadd.f32 %v688_v18, %v224_v2 }
 0x2c3   :  { %v681_v39 = vsel %vm680_vm2, %v1369_v56, %v677_v24  ;;  %1370 = vtanh.f32 %v689_v19 }
 0x2c4   :  { %v686_v40 = vsel %vm683_vm3, %v685_v38, %v681_v39 }
 0x2c5   :  { %v691_v41 = vsub.f32 1.0, %v686_v40  ;;  %v693_v26 = vmul.f32 %v686_v40, %v1788_v25 }
 0x2c9   :  { %v1371_v43 = vpop.eup %1370 }
 0x2ca   :  { %v692_v44 = vmul.f32 %v1371_v43, %v691_v41 }
 0x2cc   :  { %v1830_v45 = vadd.f32 %v693_v26, %v692_v44 }
 0x2ce   :  { %1297 = vmatmul.msk.f32.vlgmr.msra.gmra.mxu0 %vm251_vm10, %v1830_v45  ;;  %1298 = vmatmul.msk.f32.vlgmr.msra.gmra.mxu1 %vm251_vm10, %v1830_v45 }
 0x2cf   :  { %1299 = vmatmul.msk.f32.vlgmr.msra.gmra.mxu2 %vm251_vm10, %v1830_v45  ;;  %970 = vmatpush.msra.mxu0 %v1571_v6 }
 0x2d0   :  { %1040 = vmatpush.msra.mxu1 %v1543_v0  ;;  %1060 = vmatpush.msra.mxu2 %v1581_v8  ;;  %v129_v0 = vadd.f32 %v1665_v17, %v1775_v21 }
 0x2d1   :  { %971 = vmatpush.msra.mxu0 %v1587_v9 }
 0x2d2   :  { %1041 = vmatpush.msra.mxu1 %v1548_v1  ;;  %1061 = vmatpush.msra.mxu2 %v1607_v13  ;;  %v178_v1 = vadd.f32 %v1671_v22, %v1808_v27 }
 0x2d3   :  { %972 = vmatpush.msra.mxu0 %v1595_v10 }
 0x2d4   :  { %1042 = vmatpush.msra.mxu1 %v1557_v3  ;;  %1062 = vmatpush.msra.mxu2 %v1620_v15 }
 0x2d5   :  { %973 = vmatpush.msra.mxu0 %v1614_v14 }
 0x2d6   :  { %1043 = vmatpush.msra.mxu1 %v1576_v7  ;;  %1063 = vmatpush.msra.mxu2 %v1629_v16 }
 0x34b   :  { %v715_v8 = vpop.f32.mrf.mxu0  ;;  %v735_v13 = vpop.f32.mrf.mxu1 }
 0x34c   :  { %v758_v25 = vadd.f32 %v715_v8, %v129_v0  ;;  %v778_v46 = vadd.f32 %v735_v13, %v178_v1 }
 0x34e   :  { %v1300_v47 = vmul.f32 -1.442695, %v758_v25  ;;  %v1301_v3 = vmul.f32 -1.442695, %v778_v46 }
 0x350   :  { %1372 = vpow2.f32 %v1300_v47 }
 0x351   :  { %1374 = vpow2.f32 %v1301_v3 }
 0x352   :  { %v755_v56 = vpop.f32.mrf.mxu2 }
 0x353   :  { %v756_v59 = vadd.f32 %v1683_v36, %v755_v56 }
 0x356   :  { %v1373_v15 = vpop.eup %1372 }
 0x357   :  { %v1375_v48 = vpop.eup %1374  ;;  %v762_v49 = vadd.f32 1.0, %v1373_v15 }
 0x358   :  { %v782_v7 = vadd.f32 1.0, %v1375_v48 }
 0x359   :  { %1376 = vrcp.f32 %v762_v49  ;;  %v774_v53 = vand.u32 2147483648, %v762_v49  ;;  %v772_v54 = vand.u32 2147483647, %v762_v49  ;;  %vm768_vm5 = vweird.f32 %v762_v49 }
 0x35a   :  { %1378 = vrcp.f32 %v782_v7  ;;  %v794_v2 = vand.u32 2147483648, %v782_v7  ;;  %vm788_vm9 = vweird.f32 %v782_v7  ;;  %v792_v11 = vand.u32 2147483647, %v782_v7 }
 0x35b   :  { %v775_v58 = vor.u32 1.1754944e-38, %v774_v53  ;;  %vm773_vm7 = vcmp.eq.f32.partialorder %v772_v54, 8.507059e+37  ;;  %v230_v53 = vadd.f32 %v1688_v42, %v1814_v31  ;;  %v135_v31 = vadd.f32 %v1665_v17, %v1780_v29 }
 0x35c   :  { %v795_v5 = vor.u32 1.1754944e-38, %v794_v2  ;;  %vm793_vm12 = vcmp.eq.f32.partialorder %v792_v11, 8.507059e+37 }
 0x35f   :  { %v1377_v16 = vpop.eup %1376 }
 0x360   :  { %v1379_v50 = vpop.eup %1378  ;;  %v764_v21 = vmul.f32 %v1377_v16, %v762_v49  ;;  %vm769_vm4 = vweird.f32 %v1377_v16 }
 0x361   :  { %v784_v51 = vmul.f32 %v1379_v50, %v782_v7  ;;  %vm770_vm6 = vmor %vm768_vm5, %vm769_vm4  ;;  %vm789_vm8 = vweird.f32 %v1379_v50 }
 0x362   :  { %v765_v52 = vsub.f32 1.0, %v764_v21  ;;  %vm790_vm11 = vmor %vm788_vm9, %vm789_vm8 }
 0x363   :  { %v785_v27 = vsub.f32 1.0, %v784_v51 }
 0x364   :  { %v766_v20 = vmul.f32 %v1377_v16, %v765_v52 }
 0x365   :  { %v786_v55 = vmul.f32 %v1379_v50, %v785_v27 }
 0x366   :  { %v767_v57 = vadd.f32 %v1377_v16, %v766_v20 }
 0x367   :  { %v787_v61 = vadd.f32 %v1379_v50, %v786_v55 }
 0x368   :  { %v771_v60 = vsel %vm770_vm6, %v1377_v16, %v767_v57 }
 0x369   :  { %v776_v62 = vsel %vm773_vm7, %v775_v58, %v771_v60  ;;  %v791_v18 = vsel %vm790_vm11, %v1379_v50, %v787_v61 }
 0x36a   :  { %v798_v4 = vmul.f32 %v776_v62, %v756_v59  ;;  %v796_v24 = vsel %vm793_vm12, %v795_v5, %v791_v18 }
 0x36b   :  { %v801_v19 = vsub.f32 1.0, %v796_v24  ;;  %v803_v40 = vmul.f32 %v796_v24, %v1830_v45  ;;  %v132_v45 = vadd.f32 %v1665_v17, %v1777_v23 }
 0x36c   :  { %v799_v12 = vadd.f32 %v798_v4, %v227_v63  ;;  %v184_v4 = vadd.f32 %v1671_v22, %v1816_v32 }
 0x36e   :  { %1380 = vtanh.f32 %v799_v12 }
 0x374   :  { %v1381_v38 = vpop.eup %1380 }
 0x375   :  { %v802_v39 = vmul.f32 %v1381_v38, %v801_v19 }
 0x377   :  { %v804_v41 = vadd.f32 %v803_v40, %v802_v39 }
 0x379   :  { %1302 = vmatmul.msk.f32.vlgmr.msrb.gmra.mxu3 %vm251_vm10, %v804_v41  ;;  %1303 = vmatmul.msk.f32.vlgmr.msrb.gmra.mxu0 %vm251_vm10, %v804_v41 }
 0x37a   :  { %1304 = vmatmul.msk.f32.vlgmr.msrb.gmra.mxu1 %vm251_vm10, %v804_v41  ;;  %1080 = vmatpush.msrb.mxu3 %v1571_v6 }
 0x37c   :  { %1081 = vmatpush.msrb.mxu3 %v1587_v9 }
 0x37e   :  { %1082 = vmatpush.msrb.mxu3 %v1595_v10 }
 0x380   :  { %1083 = vmatpush.msrb.mxu3 %v1614_v14 }
 0x3f6   :  { %v845_v43 = vpop.f32.mrf.mxu0 }
 0x3f7   :  { %v888_v44 = vadd.f32 %v845_v43, %v181_v28  ;;  %v865_v7 = vpop.f32.mrf.mxu1 }
 0x3f8   :  { %v866_v21 = vadd.f32 %v1683_v36, %v865_v7 }
 0x3f9   :  { %v1306_v26 = vmul.f32 -1.442695, %v888_v44 }
 0x3fb   :  { %1382 = vpow2.f32 %v1306_v26 }
 0x3fc   :  { %v825_v0 = vpop.f32.mrf.mxu3 }
 0x3fd   :  { %v868_v1 = vadd.f32 %v825_v0, %v132_v45 }
 0x3ff   :  { %v1305_v8 = vmul.f32 -1.442695, %v868_v1 }
 0x401   :  { %v1383_v6 = vpop.eup %1382  ;;  %1384 = vpow2.f32 %v1305_v8 }
 0x402   :  { %v892_v9 = vadd.f32 1.0, %v1383_v6 }
 0x404   :  { %1386 = vrcp.f32 %v892_v9  ;;  %v904_v20 = vand.u32 2147483648, %v892_v9  ;;  %vm898_vm2 = vweird.f32 %v892_v9  ;;  %v902_v55 = vand.u32 2147483647, %v892_v9 }
 0x406   :  { %v905_v58 = vor.u32 1.1754944e-38, %v904_v20  ;;  %vm903_vm4 = vcmp.eq.f32.partialorder %v902_v55, 8.507059e+37 }
 0x407   :  { %v1385_v10 = vpop.eup %1384 }
 0x408   :  { %v872_v13 = vadd.f32 1.0, %v1385_v10 }
 0x40a   :  { %1388 = vrcp.f32 %v872_v13  ;;  %v1387_v14 = vpop.eup %1386  ;;  %v884_v15 = vand.u32 2147483648, %v872_v13  ;;  %v882_v23 = vand.u32 2147483647, %v872_v13  ;;  %vm878_vm14 = vweird.f32 %v872_v13 }
 0x40b   :  { %v894_v25 = vmul.f32 %v1387_v14, %v892_v9  ;;  %vm899_vm1 = vweird.f32 %v1387_v14 }
 0x40c   :  { %v885_v50 = vor.u32 1.1754944e-38, %v884_v15  ;;  %vm883_vm0 = vcmp.eq.f32.partialorder %v882_v23, 8.507059e+37  ;;  %vm900_vm3 = vmor %vm898_vm2, %vm899_vm1 }
 0x40d   :  { %v895_v47 = vsub.f32 1.0, %v894_v25  ;;  %v233_v25 = vadd.f32 %v1688_v42, %v1818_v33  ;;  %v1418_v42 = vld [vmem:[%s1947_s7] ss:$0 sm:$0xff] }
 0x40e   :  { %v138_v33 = vadd.f32 %v1418_v42, %v1783_v37  ;;  %v1331_v42 = vld [vmem:[%s1956_s16] ss:$0 sm:$0xff]  ;;  %s1244_s16 = sshll.u32 %s1957_s17, 4  ;;  %s1245_s16 = int_to_ptr.hbm [resolvable:$true] %s1244_s16 }
 0x40f   :  { %v896_v49 = vmul.f32 %v1387_v14, %v895_v47 }
 0x410   :  { %v1389_v30 = vpop.eup %1388 }
 0x411   :  { %v874_v46 = vmul.f32 %v1389_v30, %v872_v13  ;;  %vm879_vm13 = vweird.f32 %v1389_v30  ;;  %v897_v52 = vadd.f32 %v1387_v14, %v896_v49 }
 0x412   :  { %vm880_vm15 = vmor %vm878_vm14, %vm879_vm13 }
 0x413   :  { %v875_v3 = vsub.f32 1.0, %v874_v46  ;;  %v901_v57 = vsel %vm900_vm3, %v1387_v14, %v897_v52 }
 0x414   :  { %v906_v59 = vsel %vm903_vm4, %v905_v58, %v901_v57  ;;  %v1148_v57 = vld [vmem:[%s1953_s13 + $0x18] sm:$0xff]  ;;  %v1147_v58 = vld [vmem:[%s1953_s13 + $0x10] sm:$0xff] }
 0x415   :  { %v876_v48 = vmul.f32 %v1389_v30, %v875_v3  ;;  %v911_v60 = vsub.f32 1.0, %v906_v59  ;;  %v913_v63 = vmul.f32 %v906_v59, %v804_v41  ;;  %1168 = vmatpush.msrb.mxu0 %v1148_v57  ;;  %v1145_v59 = vld [vmem:[%s1953_s13] sm:$0xff] }
 0x417   :  { %v877_v16 = vadd.f32 %v1389_v30, %v876_v48  ;;  %1169 = vmatpush.msrb.mxu0 %v1147_v58 }
 0x419   :  { %v881_v51 = vsel %vm880_vm15, %v1389_v30, %v877_v16 }
 0x41a   :  { %v886_v27 = vsel %vm883_vm0, %v885_v50, %v881_v51 }
 0x41b   :  { %v908_v54 = vmul.f32 %v886_v27, %v866_v21  ;;  %v1419_v27 = vld [vmem:[%s1948_s8] ss:$0 sm:$0xff] }
 0x41d   :  { %v909_v56 = vadd.f32 %v908_v54, %v230_v53  ;;  %v187_v53 = vadd.f32 %v1419_v27, %v1820_v34  ;;  %v1146_v34 = vld [vmem:[%s1953_s13 + $0x8] sm:$0xff] }
 0x41e   :  { %1170 = vmatpush.msrb.mxu0 %v1146_v34 }
 0x41f   :  { %1390 = vtanh.f32 %v909_v56 }
 0x420   :  { %1171 = vmatpush.msrb.mxu0 %v1145_v59 }
 0x425   :  { %v1391_v61 = vpop.eup %1390 }
 0x426   :  { %v912_v62 = vmul.f32 %v1391_v61, %v911_v60 }
 0x428   :  { %v914_v2 = vadd.f32 %v913_v63, %v912_v62 }
 0x42a   :  { %1307 = vmatmul.msk.f32.vlgmr.msrb.gmra.mxu2 %vm251_vm10, %v914_v2  ;;  %1308 = vmatmul.msk.f32.vlgmr.msra.gmra.mxu3 %vm251_vm10, %v914_v2 }
 0x42b   :  { %1309 = vmatmul.msk.f32.vlgmr.msra.gmra.mxu0 %vm251_vm10, %v914_v2 }
 0x4a8   :  { %v975_v0 = vpop.f32.mrf.mxu0 }
 0x4a9   :  { %v976_v9 = vadd.f32 %v1683_v36, %v975_v0 }
 0x4ad   :  { %v935_v11 = vpop.f32.mrf.mxu2  ;;  %v955_v12 = vpop.f32.mrf.mxu3 }
 0x4ae   :  { %v978_v18 = vadd.f32 %v935_v11, %v135_v31  ;;  %v998_v5 = vadd.f32 %v955_v12, %v184_v4 }
 0x4b0   :  { %v1310_v24 = vmul.f32 -1.442695, %v978_v18  ;;  %v1311_v19 = vmul.f32 -1.442695, %v998_v5 }
 0x4b2   :  { %1392 = vpow2.f32 %v1310_v24 }
 0x4b3   :  { %1394 = vpow2.f32 %v1311_v19 }
 0x4b8   :  { %v1393_v38 = vpop.eup %1392 }
 0x4b9   :  { %v1395_v39 = vpop.eup %1394  ;;  %v982_v40 = vadd.f32 1.0, %v1393_v38 }
 0x4ba   :  { %v1002_v41 = vadd.f32 1.0, %v1395_v39  ;;  %v1420_v39 = vld [vmem:[%s1950_s10] ss:$0 sm:$0xff] }
 0x4bb   :  { %1396 = vrcp.f32 %v982_v40  ;;  %v994_v22 = vand.u32 2147483648, %v982_v40  ;;  %v992_v45 = vand.u32 2147483647, %v982_v40  ;;  %vm988_vm6 = vweird.f32 %v982_v40 }
 0x4bc   :  { %1398 = vrcp.f32 %v1002_v41  ;;  %v1014_v46 = vand.u32 2147483648, %v1002_v41  ;;  %vm1008_vm11 = vweird.f32 %v1002_v41  ;;  %v1012_v47 = vand.u32 2147483647, %v1002_v41 }
 0x4bd   :  { %v995_v6 = vor.u32 1.1754944e-38, %v994_v22  ;;  %vm993_vm8 = vcmp.eq.f32.partialorder %v992_v45, 8.507059e+37 }
 0x4be   :  { %v1015_v48 = vor.u32 1.1754944e-38, %v1014_v46  ;;  %vm1013_vm13 = vcmp.eq.f32.partialorder %v1012_v47, 8.507059e+37  ;;  %v1183_v47 = vld [vmem:[%s1955_s15 + $0x8] sm:$0x7f] }
 0x4c1   :  { %v1397_v28 = vpop.eup %1396 }
 0x4c2   :  { %v1399_v43 = vpop.eup %1398  ;;  %v984_v17 = vmul.f32 %v1397_v28, %v982_v40  ;;  %vm989_vm5 = vweird.f32 %v1397_v28 }
 0x4c3   :  { %v1004_v29 = vmul.f32 %v1399_v43, %v1002_v41  ;;  %vm990_vm7 = vmor %vm988_vm6, %vm989_vm5  ;;  %vm1009_vm9 = vweird.f32 %v1399_v43  ;;  %vm1192_vm6 = vcmask 1046528  }
 0x4c4   :  { %v985_v44 = vsub.f32 1.0, %v984_v17  ;;  %vm1010_vm12 = vmor %vm1008_vm11, %vm1009_vm9  ;;  %1319 = vmatpush.msk.msrb.mxu1 %vm1192_vm6, %v1183_v47 }
 0x4c5   :  { %v1005_v32 = vsub.f32 1.0, %v1004_v29 }
 0x4c6   :  { %v986_v26 = vmul.f32 %v1397_v28, %v985_v44 }
 0x4c7   :  { %v1006_v1 = vmul.f32 %v1399_v43, %v1005_v32 }
 0x4c8   :  { %v987_v8 = vadd.f32 %v1397_v28, %v986_v26 }
 0x4c9   :  { %v1007_v14 = vadd.f32 %v1399_v43, %v1006_v1 }
 0x4ca   :  { %v991_v10 = vsel %vm990_vm7, %v1397_v28, %v987_v8  ;;  %v1421_v28 = vld [vmem:[%s1949_s9] ss:$0 sm:$0xff] }
 0x4cb   :  { %v996_v13 = vsel %vm993_vm8, %v995_v6, %v991_v10  ;;  %v1011_v15 = vsel %vm1010_vm12, %v1399_v43, %v1007_v14  ;;  %v236_v43 = vadd.f32 %v1421_v28, %v1822_v35  ;;  %vm1235_vm12 = vcmask 9216  }
 0x4cc   :  { %v1018_v30 = vmul.f32 %v996_v13, %v976_v9  ;;  %v1016_v23 = vsel %vm1013_vm13, %v1015_v48, %v1011_v15  ;;  %v1328_v13 = vld [vmem:[%s1951_s11] ss:$0 sm:$0xff] }
 0x4cd   :  { %v1021_v36 = vsub.f32 1.0, %v1016_v23  ;;  %v1023_v16 = vmul.f32 %v1016_v23, %v914_v2  ;;  %v1330_v15 = vld [vmem:[%s1954_s14] ss:$0 sm:$0xff]  ;;  %s1449_s14 = smov [#allocation2]  }
 0x4ce   :  { %v1019_v3 = vadd.f32 %v1018_v30, %v233_v25  ;;  %v1329_v25 = vld [vmem:[%s1952_s12] ss:$0 sm:$0xff] }
 0x4d0   :  { %1400 = vtanh.f32 %v1019_v3  ;;  %v1182_v3 = vld [vmem:[%s1955_s15] sm:$0xff]  ;;  %s1242_s15 = sshll.u32 %s1449_s14, 4  ;;  %s1243_s15 = int_to_ptr.vmem [resolvable:$true] %s1242_s15 }
 0x4d1   :  { %1211 = vmatpush.msrb.mxu1 %v1182_v3 }
 0x4d6   :  { %v1401_v49 = vpop.eup %1400 }
 0x4d7   :  { %v1022_v7 = vmul.f32 %v1401_v49, %v1021_v36 }
 0x4d9   :  { %v1882_v50 = vadd.f32 %v1023_v16, %v1022_v7 }
 0x4db   :  { %1312 = vmatmul.msk.f32.vlgmr.msra.gmra.mxu1 %vm251_vm10, %v1882_v50  ;;  %1313 = vmatmul.msk.f32.vlgmr.msra.gmra.mxu2 %vm251_vm10, %v1882_v50 }
 0x4dc   :  { %1314 = vmatmul.msk.f32.vlgmr.msrb.gmra.mxu3 %vm251_vm10, %v1882_v50 }
 0x558   :  { %v1045_v21 = vpop.f32.mrf.mxu1 }
 0x559   :  { %v1088_v51 = vadd.f32 %v1045_v21, %v138_v33 }
 0x55b   :  { %v1315_v52 = vmul.f32 -1.442695, %v1088_v51 }
 0x55d   :  { %1402 = vpow2.f32 %v1315_v52 }
 0x55e   :  { %v1065_v20 = vpop.f32.mrf.mxu2 }
 0x55f   :  { %v1108_v54 = vadd.f32 %v1065_v20, %v187_v53  ;;  %v1085_v18 = vpop.f32.mrf.mxu3 }
 0x560   :  { %v1086_v40 = vadd.f32 %v1420_v39, %v1085_v18 }
 0x561   :  { %v1316_v55 = vmul.f32 -1.442695, %v1108_v54 }
 0x563   :  { %v1403_v56 = vpop.eup %1402  ;;  %1404 = vpow2.f32 %v1316_v55 }
 0x564   :  { %v1092_v37 = vadd.f32 1.0, %v1403_v56 }
 0x566   :  { %1406 = vrcp.f32 %v1092_v37  ;;  %v1104_v31 = vand.u32 2147483648, %v1092_v37  ;;  %v1102_v11 = vand.u32 2147483647, %v1092_v37  ;;  %vm1098_vm15 = vweird.f32 %v1092_v37 }
 0x568   :  { %v1105_v19 = vor.u32 1.1754944e-38, %v1104_v31  ;;  %vm1103_vm1 = vcmp.eq.f32.partialorder %v1102_v11, 8.507059e+37 }
 0x569   :  { %v1405_v60 = vpop.eup %1404 }
 0x56a   :  { %v1112_v61 = vadd.f32 1.0, %v1405_v60 }
 0x56c   :  { %v1407_v62 = vpop.eup %1406  ;;  %1408 = vrcp.f32 %v1112_v61  ;;  %v1124_v44 = vand.u32 2147483648, %v1112_v61  ;;  %v1122_v32 = vand.u32 2147483647, %v1112_v61  ;;  %vm1118_vm3 = vweird.f32 %v1112_v61 }
 0x56d   :  { %v1094_v63 = vmul.f32 %v1407_v62, %v1092_v37  ;;  %vm1099_vm14 = vweird.f32 %v1407_v62 }
 0x56e   :  { %vm1100_vm0 = vmor %vm1098_vm15, %vm1099_vm14  ;;  %v1125_v0 = vor.u32 1.1754944e-38, %v1124_v44  ;;  %vm1123_vm5 = vcmp.eq.f32.partialorder %v1122_v32, 8.507059e+37 }
 0x56f   :  { %v1095_v2 = vsub.f32 1.0, %v1094_v63 }
 0x571   :  { %v1096_v4 = vmul.f32 %v1407_v62, %v1095_v2 }
 0x572   :  { %v1409_v12 = vpop.eup %1408 }
 0x573   :  { %v1114_v5 = vmul.f32 %v1409_v12, %v1112_v61  ;;  %v1097_v24 = vadd.f32 %v1407_v62, %v1096_v4  ;;  %vm1119_vm2 = vweird.f32 %v1409_v12 }
 0x574   :  { %vm1120_vm4 = vmor %vm1118_vm3, %vm1119_vm2 }
 0x575   :  { %v1115_v38 = vsub.f32 1.0, %v1114_v5  ;;  %v1101_v41 = vsel %vm1100_vm0, %v1407_v62, %v1097_v24 }
 0x576   :  { %v1106_v17 = vsel %vm1103_vm1, %v1105_v19, %v1101_v41 }
 0x577   :  { %v1116_v29 = vmul.f32 %v1409_v12, %v1115_v38  ;;  %v1128_v22 = vmul.f32 %v1106_v17, %v1086_v40 }
 0x579   :  { %v1117_v26 = vadd.f32 %v1409_v12, %v1116_v29  ;;  %v1129_v45 = vadd.f32 %v1128_v22, %v236_v43 }
 0x57b   :  { %v1121_v1 = vsel %vm1120_vm4, %v1409_v12, %v1117_v26  ;;  %1410 = vtanh.f32 %v1129_v45 }
 0x57c   :  { %v1126_v8 = vsel %vm1123_vm5, %v1125_v0, %v1121_v1 }
 0x57d   :  { %v1131_v6 = vsub.f32 1.0, %v1126_v8  ;;  %v1133_v35 = vmul.f32 %v1126_v8, %v1882_v50 }
 0x581   :  { %v1411_v9 = vpop.eup %1410 }
 0x582   :  { %v1132_v10 = vmul.f32 %v1411_v9, %v1131_v6 }
 0x584   :  { %v1134_v14 = vadd.f32 %v1133_v35, %v1132_v10 }
 0x586   :  { %v1139_v30 = vmul.f32 %v1328_v13, %v1134_v14 }
 0x588   :  { %v1144_v46 = vadd.f32 %v1329_v25, %v1139_v30 }
 0x58a   :  { %1317 = vmatmul.msk.f32.vlgmr.msrb.gmra.mxu0 %vm251_vm10, %v1144_v46  ;;  %vm1188_vm10 = vcmask 121856  }
 0x607   :  { %v1173_v48 = vpop.f32.mrf.mxu0 }
 0x608   :  { %v1174_v23 = vadd.f32 %v1330_v15, %v1173_v48 }
 0x60a   :  { %v1177_v36 = vmin.f32 %v1174_v23, 0.0  ;;  %vm1176_vm7 = vcmp.gt.f32.partialorder %v1174_v23, 0.0 }
 0x60c   :  { %v1178_v49 = vmul.f32 1.442695, %v1177_v36 }
 0x60e   :  { %1412 = vpow2.f32 %v1178_v49 }
 0x614   :  { %v1413_v7 = vpop.eup %1412 }
 0x615   :  { %v1318_v16 = vadd.f32 -1.0, %v1413_v7 }
 0x617   :  { %v1181_v50 = vsel %vm1176_vm7, %v1174_v23, %v1318_v16 }
 0x618   :  { %1320 = vmatmul.msk.f32.vlgmr.msrb.gmra.mxu1 %vm1188_vm10, %v1181_v50 }
 0x695   :  { %v1213_v33 = vpop.f32.mrf.mxu1 }
 0x696   :  { %v1214_v21 = vadd.f32 %v1331_v42, %v1213_v33 }
 0x698   :  { %v1321_v51 = vmul.f32 -1.442695, %v1214_v21 }
 0x69a   :  { %1414 = vpow2.f32 %v1321_v51 }
 0x6a0   :  { %v1415_v52 = vpop.eup %1414 }
 0x6a1   :  { %v1219_v27 = vadd.f32 1.0, %v1415_v52 }
 0x6a3   :  { %1416 = vrcp.f32 %v1219_v27  ;;  %v1231_v55 = vand.u32 2147483648, %v1219_v27  ;;  %v1229_v57 = vand.u32 2147483647, %v1219_v27  ;;  %vm1225_vm9 = vweird.f32 %v1219_v27 }
 0x6a5   :  { %v1232_v58 = vor.u32 1.1754944e-38, %v1231_v55  ;;  %vm1230_vm13 = vcmp.eq.f32.partialorder %v1229_v57, 8.507059e+37 }
 0x6a9   :  { %v1417_v53 = vpop.eup %1416 }
 0x6aa   :  { %v1221_v20 = vmul.f32 %v1417_v53, %v1219_v27  ;;  %vm1226_vm8 = vweird.f32 %v1417_v53 }
 0x6ab   :  { %vm1227_vm11 = vmor %vm1225_vm9, %vm1226_vm8 }
 0x6ac   :  { %v1222_v54 = vsub.f32 1.0, %v1221_v20 }
 0x6ae   :  { %v1223_v56 = vmul.f32 %v1417_v53, %v1222_v54 }
 0x6b0   :  { %v1224_v37 = vadd.f32 %v1417_v53, %v1223_v56 }
 0x6b2   :  { %v1228_v34 = vsel %vm1227_vm11, %v1417_v53, %v1224_v37 }
 0x6b3   :  { %v1233_v59 = vsel %vm1230_vm13, %v1232_v58, %v1228_v34 }
 0x6b4   :  { %1236 = vst.msk [vmem:[#allocation2] sm:$0x3] %vm1235_vm12, %v1233_v59 }
 0x6b5   :  { %1247 = dma.vmem_to_hbm [thread:$0]  %s1243_s15, 32, %s1245_s16, [#allocation3]  }
 0x6b6   :  { %1446 = dma.done.wait [#allocation3], 32  }
 0x6b7   :  { %1447 = vsyncadd [#allocation3], 4294967264 }
 0x6b8   :  { %1252 = vsyncpa [#allocation3], 1 }

</bundles_post_ra>
